<compile_context>
chip_gen: v6e
topology: v6e:2x2x1
jax: 0.10.0
libtpu: 0.0.40
codegen_flags: <defaults>
</compile_context>

<pallas_src>
import jax
import jax.numpy as jnp
from jax.experimental import pallas as pl
from jax.experimental.pallas import tpu as pltpu

DATA_DIM = 5
HIDDEN_DIM = 32
TDIM = 1
ZDIM = 4
MDIM = 6
BATCH = 8

F32 = jnp.float32
NEG = -1.0e30          # softmax padding logit (exp underflows to exactly 0)
LANE = 128
K_PAD = 128            # every packed weight band is zero-padded to 128 contraction rows

# ---- column offsets of each weight inside the packed (128, W_LANES) weight slab ----
C_FC2   = 0 * LANE           # (data_dim, hidden)
C_FC23  = 1 * LANE           # (hidden, hidden)
C_FC24  = 2 * LANE
C_FC25  = 3 * LANE
C_HEADS = 4 * LANE           # fused [fc41_h | fc51_h | fc61_h], 512 lanes total
C_W41H  = C_HEADS            #   (hidden, tdim*150)  band width 256
C_W51H  = C_HEADS + 256      #   (hidden, zdim*3)    band width 128
C_W61H  = C_HEADS + 384      #   (hidden, mdim*15)   band width 128
C_W52   = C_HEADS + 512      # (zdim, hidden)
C_W62   = C_W52 + LANE       # (mdim, mdim*3)
C_W41Y  = C_W62 + LANE       # (tdim*10, tdim*150)   band width 256
C_W51Y  = C_W41Y + 256       # (hidden, zdim*3)
C_W61Y  = C_W51Y + LANE      # (mdim*3, mdim*15)
C_W4A   = C_W61Y + LANE      # fc4 rows [0:128)   -> (128, tdim)
C_W4B   = C_W4A + LANE       # fc4 rows [128:150) -> (22, tdim)
C_W5    = C_W4B + LANE       # (zdim*3, zdim)
C_W6    = C_W5 + LANE        # (mdim*15, mdim)
W_LANES = C_W6 + LANE        # = 2304

# ---- rows of the packed (16, 256) bias/row slab ----
B_ROWS, B_LANES = 16, 256
R_B2, R_B23, R_B24, R_B25 = 0, 1, 2, 3
R_B41, R_B51, R_B61 = 4, 5, 6
R_B42, R_B52, R_B62 = 7, 8, 9
R_B4, R_B5, R_B6 = 10, 11, 12
R_W42 = 13                   # fc42 weight stored as a (1, tdim*10) row (used on the VPU)

# ---- rows of the small runtime y-summary slab (8, 128) ----
R_YZ, R_YM, R_YT = 0, 1, 2


def init_params(key, data_dim, hidden_dim, tdim, zdim, mdim):
    """Deterministic synthetic init (uniform +-1/sqrt(fan_in), like torch Linear).
    Weights stored transposed vs torch: (in_features, out_features); bias (1, out)."""
    dims = {
        "fc2":  (data_dim, hidden_dim),
        "fc23": (hidden_dim, hidden_dim),
        "fc24": (hidden_dim, hidden_dim),
        "fc25": (hidden_dim, hidden_dim),
        "fc42": (tdim, tdim * 10),
        "fc52": (zdim, hidden_dim),
        "fc62": (mdim, mdim * 3),
        "fc41": (hidden_dim + tdim * 10, tdim * 150),
        "fc4":  (tdim * 150, tdim),
        "fc51": (hidden_dim * 2, zdim * 3),
        "fc5":  (zdim * 3, zdim),
        "fc61": (hidden_dim + mdim * 3, mdim * 15),
        "fc6":  (mdim * 15, mdim),
    }
    params = {}
    keys = jax.random.split(key, len(dims))
    for k_, (name, (din, dout)) in zip(keys, dims.items()):
        kw, kb = jax.random.split(k_)
        bound = 1.0 / (din ** 0.5)
        params[name] = (
            jax.random.uniform(kw, (din, dout), F32, -bound, bound),
            jax.random.uniform(kb, (1, dout), F32, -bound, bound),
        )
    return params


def pack_params(params, *, data_dim=DATA_DIM, hidden_dim=HIDDEN_DIM,
                tdim=TDIM, zdim=ZDIM, mdim=MDIM):
    """One-time host-side packing of all Linear params into two lane-dense slabs."""
    assert tdim == 1, "forward() only type-checks when tdim == 1"
    assert max(data_dim, hidden_dim, zdim * 3, mdim * 3, mdim * 15, zdim, mdim) <= K_PAD
    assert tdim * 150 <= 256

    w41, b41 = params["fc41"]
    w51, b51 = params["fc51"]
    w61, b61 = params["fc61"]
    w41h, w41y = w41[:hidden_dim], w41[hidden_dim:]
    w51h, w51y = w51[:hidden_dim], w51[hidden_dim:]
    w61h, w61y = w61[:hidden_dim], w61[hidden_dim:]
    w4, b4 = params["fc4"]

    wslab = jnp.zeros((K_PAD, W_LANES), F32)

    def put_w(slab, arr, col):
        k, n = arr.shape
        return slab.at[:k, col:col + n].set(arr.astype(F32))

    wslab = put_w(wslab, params["fc2"][0],  C_FC2)
    wslab = put_w(wslab, params["fc23"][0], C_FC23)
    wslab = put_w(wslab, params["fc24"][0], C_FC24)
    wslab = put_w(wslab, params["fc25"][0], C_FC25)
    wslab = put_w(wslab, w41h, C_W41H)
    wslab = put_w(wslab, w51h, C_W51H)
    wslab = put_w(wslab, w61h, C_W61H)
    wslab = put_w(wslab, params["fc52"][0], C_W52)
    wslab = put_w(wslab, params["fc62"][0], C_W62)
    wslab = put_w(wslab, w41y, C_W41Y)
    wslab = put_w(wslab, w51y, C_W51Y)
    wslab = put_w(wslab, w61y, C_W61Y)
    wslab = put_w(wslab, w4[:K_PAD], C_W4A)
    wslab = put_w(wslab, w4[K_PAD:], C_W4B)
    wslab = put_w(wslab, params["fc5"][0], C_W5)
    wslab = put_w(wslab, params["fc6"][0], C_W6)

    bslab = jnp.zeros((B_ROWS, B_LANES), F32)

    def put_b(slab, vec, row):
        return slab.at[row:row + 1, :vec.shape[1]].set(vec.astype(F32))

    bslab = put_b(bslab, params["fc2"][1],  R_B2)
    bslab = put_b(bslab, params["fc23"][1], R_B23)
    bslab = put_b(bslab, params["fc24"][1], R_B24)
    bslab = put_b(bslab, params["fc25"][1], R_B25)
    bslab = put_b(bslab, b41, R_B41)
    bslab = put_b(bslab, b51, R_B51)
    bslab = put_b(bslab, b61, R_B61)
    bslab = put_b(bslab, params["fc42"][1], R_B42)
    bslab = put_b(bslab, params["fc52"][1], R_B52)
    bslab = put_b(bslab, params["fc62"][1], R_B62)
    bslab = put_b(bslab, b4, R_B4)
    # softmax heads: padded logit lanes get a very negative bias -> exp() == 0 there
    bslab = bslab.at[R_B5, :].set(NEG)
    bslab = put_b(bslab, params["fc5"][1], R_B5)
    bslab = bslab.at[R_B6, :].set(NEG)
    bslab = put_b(bslab, params["fc6"][1], R_B6)
    # fc42 weight as a lane row (consumed on the VPU, not the MXU)
    bslab = put_b(bslab, params["fc42"][0], R_W42)
    return {"w": wslab, "b": bslab}


def encoder_kernel(x_ref, y_ref, w_ref, b_ref, out_ref):
    f32 = jnp.float32

    def dot(a, col, width):
        # static, 128-lane-aligned slice of the packed weight slab (zero runtime cost)
        return jnp.dot(a, w_ref[:, col:col + width], preferred_element_type=f32)

    def bias(row, width=LANE):
        return b_ref[row:row + 1, :width]

    relu = lambda v: jnp.maximum(v, 0.0)

    def softmax_rows(v):
        v = v - jnp.max(v, axis=1, keepdims=True)
        e = jnp.exp(v)
        return e / jnp.sum(e, axis=1, keepdims=True)

    # ---- batch-independent y branches, computed once at (1, 128) ----
    y_z = y_ref[R_YZ:R_YZ + 1, :]                 # zdim sums, zero-padded lanes
    y_m = y_ref[R_YM:R_YM + 1, :]                 # mdim sums
    y_t = y_ref[R_YT:R_YT + 1, :]                 # scalar y_t broadcast over all lanes
    # fc42 is (B,1)x(1,10): a degenerate outer product -> pure VPU multiply-add
    y_t_b = relu(y_t * b_ref[R_W42:R_W42 + 1, :LANE] + bias(R_B42))
    y_z_b = relu(dot(y_z, C_W52, LANE) + bias(R_B52))
    y_m_b = relu(dot(y_m, C_W62, LANE) + bias(R_B62))
    # fold fc41(cat(h, y_t)) == h @ W41_h + (y_t @ W41_y + b41)   (same for fc51/fc61)
    off_t = dot(y_t_b, C_W41Y, 256) + bias(R_B41, 256)     # (1, 256), real lanes 0:150
    off_z = dot(y_z_b, C_W51Y, LANE) + bias(R_B51)         # (1, 128), real lanes 0:12
    off_m = dot(y_m_b, C_W61Y, LANE) + bias(R_B61)         # (1, 128), real lanes 0:90

    # ---- serial hidden chain (x padded to 128 lanes; intermediates stay 128-wide) ----
    h = relu(dot(x_ref[...], C_FC2, LANE) + bias(R_B2))
    h = relu(dot(h, C_FC23, LANE) + bias(R_B23))
    h = relu(dot(h, C_FC24, LANE) + bias(R_B24))
    h = relu(dot(h, C_FC25, LANE) + bias(R_B25))

    # ---- three heads fused into one (128, 512) MXU matmul; 128-aligned band slices ----
    heads = dot(h, C_HEADS, 512)                           # (B, 512)
    ht = relu(heads[:, 0:256] + off_t)                     # fc41 act, real lanes 0:150
    hz = relu(heads[:, 256:384] + off_z)                   # fc51 act, real lanes 0:12
    hm = relu(heads[:, 384:512] + off_m)                   # fc61 act, real lanes 0:90

    # ---- output projections; fc4's 150 contraction rows are split into two bands ----
    t_logit = (dot(ht[:, 0:LANE], C_W4A, LANE)
               + dot(ht[:, LANE:256], C_W4B, LANE)
               + bias(R_B4))
    z_logit = dot(hz, C_W5, LANE) + bias(R_B5)             # padded lanes biased to -1e30
    m_logit = dot(hm, C_W6, LANE) + bias(R_B6)

    # lane-dense (B, 384) output: three full-width, unmasked 128-lane band stores
    out_ref[:, 0:LANE] = jax.nn.sigmoid(t_logit)
    out_ref[:, LANE:2 * LANE] = softmax_rows(z_logit)
    out_ref[:, 2 * LANE:3 * LANE] = softmax_rows(m_logit)


def encoder_forward(x, y, packed, *, tdim=TDIM, zdim=ZDIM, mdim=MDIM):
    batch, data_dim = x.shape

    # --- tiny global reductions on y (exact torch semantics; host-side glue) ---
    y3 = y.reshape(tdim + 1, zdim, mdim)
    y_t = y3.sum(axis=(1, 2))[1]        # scalar -- valid because tdim == 1
    y_z = y3.sum(axis=(0, 2))           # (zdim,)
    y_m = y3.sum(axis=(0, 1))           # (mdim,)
    yrow = jnp.zeros((8, LANE), F32)
    yrow = yrow.at[R_YZ, :zdim].set(y_z.astype(F32))
    yrow = yrow.at[R_YM, :mdim].set(y_m.astype(F32))
    yrow = yrow.at[R_YT, :].set(y_t.astype(F32))

    # --- pad batch to a row-tile multiple; features to one full lane tile ---
    if batch <= 256:
        tb = bpad = max(8, -(-batch // 8) * 8)
    else:
        tb = 256
        bpad = -(-batch // tb) * tb
    x_pad = jnp.zeros((bpad, LANE), F32).at[:batch, :data_dim].set(x.astype(F32))

    out = pl.pallas_call(
        encoder_kernel,
        out_shape=jax.ShapeDtypeStruct((bpad, 3 * LANE), F32),
        grid=(bpad // tb,),
        in_specs=[
            pl.BlockSpec((tb, LANE), lambda i: (i, 0)),            # x rows (tiled over batch)
            pl.BlockSpec((8, LANE), lambda i: (0, 0)),             # y summary rows (resident)
            pl.BlockSpec((K_PAD, W_LANES), lambda i: (0, 0)),      # packed weights (resident)
            pl.BlockSpec((B_ROWS, B_LANES), lambda i: (0, 0)),     # packed biases (resident)
        ],
        out_specs=pl.BlockSpec((tb, 3 * LANE), lambda i: (i, 0)),
        compiler_params=pltpu.CompilerParams(
            dimension_semantics=("parallel",)),                    # megacore batch sharding
    )(x_pad, yrow, packed["w"], packed["b"])

    t = out[:batch, 0:tdim]
    z = out[:batch, LANE:LANE + zdim]
    m = out[:batch, 2 * LANE:2 * LANE + mdim]
    return t, z, m


def encoder_forward_ref(x, y, params, *, tdim=TDIM, zdim=ZDIM, mdim=MDIM):
    """Pure-JAX reference (mirrors the torch forward) for the correctness check."""
    batch = x.shape[0]
    y3 = y.reshape(tdim + 1, zdim, mdim)
    y_t = jnp.broadcast_to(y3.sum(axis=(1, 2))[1:2][None, :], (batch, tdim))
    y_z = jnp.broadcast_to(y3.sum(axis=(0, 2))[None, :], (batch, zdim))
    y_m = jnp.broadcast_to(y3.sum(axis=(0, 1))[None, :], (batch, mdim))

    def lin(a, name):
        w, b = params[name]
        return a @ w + b

    relu = lambda v: jnp.maximum(v, 0.0)
    y_t = relu(lin(y_t, "fc42"))
    y_z = relu(lin(y_z, "fc52"))
    y_m = relu(lin(y_m, "fc62"))
    h = relu(lin(x, "fc2"))
    h = relu(lin(h, "fc23"))
    h = relu(lin(h, "fc24"))
    h = relu(lin(h, "fc25"))
    ht = jnp.concatenate([h, y_t], axis=1)
    hz = jnp.concatenate([h, y_z], axis=1)
    hm = jnp.concatenate([h, y_m], axis=1)
    t = jax.nn.sigmoid(lin(relu(lin(ht, "fc41")), "fc4"))
    z = jax.nn.softmax(lin(relu(lin(hz, "fc51")), "fc5"), axis=1)
    m = jax.nn.softmax(lin(relu(lin(hm, "fc61")), "fc6"), axis=1)
    return t, z, m


if __name__ == "__main__":
    key = jax.random.PRNGKey(0)
    k_params, k_x, k_y = jax.random.split(key, 3)

    params = init_params(k_params, DATA_DIM, HIDDEN_DIM, TDIM, ZDIM, MDIM)
    packed = pack_params(params)               # one-time host-side packing
    x = jax.random.normal(k_x, (BATCH, DATA_DIM), F32)
    y = jax.random.normal(k_y, ((TDIM + 1) * ZDIM * MDIM,), F32)

    fwd = jax.jit(encoder_forward)
    t, z, m = fwd(x, y, packed)
    jax.block_until_ready((t, z, m))

    t_ref, z_ref, m_ref = encoder_forward_ref(x, y, params)
    assert t.shape == (BATCH, TDIM) and z.shape == (BATCH, ZDIM) and m.shape == (BATCH, MDIM)
    assert jnp.allclose(t, t_ref, atol=1e-5, rtol=1e-5)
    assert jnp.allclose(z, z_ref, atol=1e-5, rtol=1e-5)
    assert jnp.allclose(m, m_ref, atol=1e-5, rtol=1e-5)

    print("KERNEL_OK")
</pallas_src>

<mosaic_0001>
module attributes {stable_mosaic.version = 11 : i64} {
  func.func @encoder_kernel(%arg0: i32, %arg1: memref<8x128xf32, #tpu.memory_space<vmem>>, %arg2: memref<8x128xf32, #tpu.memory_space<vmem>>, %arg3: memref<128x2304xf32, #tpu.memory_space<vmem>>, %arg4: memref<16x256xf32, #tpu.memory_space<vmem>>, %arg5: memref<8x384xf32, #tpu.memory_space<vmem>>) attributes {dimension_semantics = [#tpu.dimension_semantics<parallel>], iteration_bounds = array<i64: 1>, scalar_prefetch = 0 : i64, scratch_operands = 0 : i64, tpu.core_type = #tpu.core_type<tc>, window_params = [{transform_indices = @transform_0, window_bounds = array<i64: 8, 128>}, {pipeline_mode = #tpu.pipeline_mode<synchronous>, transform_indices = @transform_1, window_bounds = array<i64: 8, 128>}, {pipeline_mode = #tpu.pipeline_mode<synchronous>, transform_indices = @transform_2, window_bounds = array<i64: 128, 2304>}, {pipeline_mode = #tpu.pipeline_mode<synchronous>, transform_indices = @transform_3, window_bounds = array<i64: 16, 256>}, {transform_indices = @transform_4, window_bounds = array<i64: 8, 384>}]} {
    %c0 = arith.constant 0 : index
    %c0_0 = arith.constant 0 : index
    %0 = vector.load %arg2[%c0, %c0_0] : memref<8x128xf32, #tpu.memory_space<vmem>>, vector<1x128xf32>
    %c1 = arith.constant 1 : index
    %c0_1 = arith.constant 0 : index
    %1 = vector.load %arg2[%c1, %c0_1] : memref<8x128xf32, #tpu.memory_space<vmem>>, vector<1x128xf32>
    %c2 = arith.constant 2 : index
    %c0_2 = arith.constant 0 : index
    %2 = vector.load %arg2[%c2, %c0_2] : memref<8x128xf32, #tpu.memory_space<vmem>>, vector<1x128xf32>
    %c13 = arith.constant 13 : index
    %c0_3 = arith.constant 0 : index
    %3 = vector.load %arg4[%c13, %c0_3] : memref<16x256xf32, #tpu.memory_space<vmem>>, vector<1x128xf32>
    %4 = arith.mulf %2, %3 : vector<1x128xf32>
    %c7 = arith.constant 7 : index
    %c0_4 = arith.constant 0 : index
    %5 = vector.load %arg4[%c7, %c0_4] : memref<16x256xf32, #tpu.memory_space<vmem>>, vector<1x128xf32>
    %6 = arith.addf %4, %5 : vector<1x128xf32>
    %cst = arith.constant 0.000000e+00 : f32
    %7 = vector.broadcast %cst : f32 to vector<1x128xf32>
    %8 = arith.maximumf %6, %7 : vector<1x128xf32>
    %c0_5 = arith.constant 0 : index
    %c1024 = arith.constant 1024 : index
    %9 = vector.load %arg3[%c0_5, %c1024] : memref<128x2304xf32, #tpu.memory_space<vmem>>, vector<128x128xf32>
    %cst_6 = arith.constant dense<0.000000e+00> : vector<1x128xf32>
    %10 = tpu.matmul %0, %9, %cst_6 {dimension_numbers = #tpu.dot_dimension_numbers<[1], [0], [0], [1], [0, 0, 1, 1], [], []>} : vector<1x128xf32>, vector<128x128xf32>, vector<1x128xf32> -> vector<1x128xf32>
    %c8 = arith.constant 8 : index
    %c0_7 = arith.constant 0 : index
    %11 = vector.load %arg4[%c8, %c0_7] : memref<16x256xf32, #tpu.memory_space<vmem>>, vector<1x128xf32>
    %12 = arith.addf %10, %11 : vector<1x128xf32>
    %cst_8 = arith.constant 0.000000e+00 : f32
    %13 = vector.broadcast %cst_8 : f32 to vector<1x128xf32>
    %14 = arith.maximumf %12, %13 : vector<1x128xf32>
    %c0_9 = arith.constant 0 : index
    %c1152 = arith.constant 1152 : index
    %15 = vector.load %arg3[%c0_9, %c1152] : memref<128x2304xf32, #tpu.memory_space<vmem>>, vector<128x128xf32>
    %cst_10 = arith.constant dense<0.000000e+00> : vector<1x128xf32>
    %16 = tpu.matmul %1, %15, %cst_10 {dimension_numbers = #tpu.dot_dimension_numbers<[1], [0], [0], [1], [0, 0, 1, 1], [], []>} : vector<1x128xf32>, vector<128x128xf32>, vector<1x128xf32> -> vector<1x128xf32>
    %c9 = arith.constant 9 : index
    %c0_11 = arith.constant 0 : index
    %17 = vector.load %arg4[%c9, %c0_11] : memref<16x256xf32, #tpu.memory_space<vmem>>, vector<1x128xf32>
    %18 = arith.addf %16, %17 : vector<1x128xf32>
    %cst_12 = arith.constant 0.000000e+00 : f32
    %19 = vector.broadcast %cst_12 : f32 to vector<1x128xf32>
    %20 = arith.maximumf %18, %19 : vector<1x128xf32>
    %c0_13 = arith.constant 0 : index
    %c1280 = arith.constant 1280 : index
    %21 = vector.load %arg3[%c0_13, %c1280] : memref<128x2304xf32, #tpu.memory_space<vmem>>, vector<128x256xf32>
    %cst_14 = arith.constant dense<0.000000e+00> : vector<1x256xf32>
    %22 = tpu.matmul %8, %21, %cst_14 {dimension_numbers = #tpu.dot_dimension_numbers<[1], [0], [0], [1], [0, 0, 1, 1], [], []>} : vector<1x128xf32>, vector<128x256xf32>, vector<1x256xf32> -> vector<1x256xf32>
    %c4 = arith.constant 4 : index
    %c0_15 = arith.constant 0 : index
    %23 = vector.load %arg4[%c4, %c0_15] : memref<16x256xf32, #tpu.memory_space<vmem>>, vector<1x256xf32>
    %24 = arith.addf %22, %23 : vector<1x256xf32>
    %c0_16 = arith.constant 0 : index
    %c1536 = arith.constant 1536 : index
    %25 = vector.load %arg3[%c0_16, %c1536] : memref<128x2304xf32, #tpu.memory_space<vmem>>, vector<128x128xf32>
    %cst_17 = arith.constant dense<0.000000e+00> : vector<1x128xf32>
    %26 = tpu.matmul %14, %25, %cst_17 {dimension_numbers = #tpu.dot_dimension_numbers<[1], [0], [0], [1], [0, 0, 1, 1], [], []>} : vector<1x128xf32>, vector<128x128xf32>, vector<1x128xf32> -> vector<1x128xf32>
    %c5 = arith.constant 5 : index
    %c0_18 = arith.constant 0 : index
    %27 = vector.load %arg4[%c5, %c0_18] : memref<16x256xf32, #tpu.memory_space<vmem>>, vector<1x128xf32>
    %28 = arith.addf %26, %27 : vector<1x128xf32>
    %c0_19 = arith.constant 0 : index
    %c1664 = arith.constant 1664 : index
    %29 = vector.load %arg3[%c0_19, %c1664] : memref<128x2304xf32, #tpu.memory_space<vmem>>, vector<128x128xf32>
    %cst_20 = arith.constant dense<0.000000e+00> : vector<1x128xf32>
    %30 = tpu.matmul %20, %29, %cst_20 {dimension_numbers = #tpu.dot_dimension_numbers<[1], [0], [0], [1], [0, 0, 1, 1], [], []>} : vector<1x128xf32>, vector<128x128xf32>, vector<1x128xf32> -> vector<1x128xf32>
    %c6 = arith.constant 6 : index
    %c0_21 = arith.constant 0 : index
    %31 = vector.load %arg4[%c6, %c0_21] : memref<16x256xf32, #tpu.memory_space<vmem>>, vector<1x128xf32>
    %32 = arith.addf %30, %31 : vector<1x128xf32>
    %c0_22 = arith.constant 0 : index
    %c0_23 = arith.constant 0 : index
    %33 = vector.load %arg1[%c0_22, %c0_23] : memref<8x128xf32, #tpu.memory_space<vmem>>, vector<8x128xf32>
    %c0_24 = arith.constant 0 : index
    %c0_25 = arith.constant 0 : index
    %34 = vector.load %arg3[%c0_24, %c0_25] : memref<128x2304xf32, #tpu.memory_space<vmem>>, vector<128x128xf32>
    %cst_26 = arith.constant dense<0.000000e+00> : vector<8x128xf32>
    %35 = tpu.matmul %33, %34, %cst_26 {dimension_numbers = #tpu.dot_dimension_numbers<[1], [0], [0], [1], [0, 0, 1, 1], [], []>} : vector<8x128xf32>, vector<128x128xf32>, vector<8x128xf32> -> vector<8x128xf32>
    %c0_27 = arith.constant 0 : index
    %c0_28 = arith.constant 0 : index
    %36 = vector.load %arg4[%c0_27, %c0_28] : memref<16x256xf32, #tpu.memory_space<vmem>>, vector<1x128xf32>
    %37 = vector.broadcast %36 : vector<1x128xf32> to vector<8x128xf32>
    %38 = arith.addf %35, %37 : vector<8x128xf32>
    %cst_29 = arith.constant 0.000000e+00 : f32
    %39 = vector.broadcast %cst_29 : f32 to vector<8x128xf32>
    %40 = arith.maximumf %38, %39 : vector<8x128xf32>
    %c0_30 = arith.constant 0 : index
    %c128 = arith.constant 128 : index
    %41 = vector.load %arg3[%c0_30, %c128] : memref<128x2304xf32, #tpu.memory_space<vmem>>, vector<128x128xf32>
    %cst_31 = arith.constant dense<0.000000e+00> : vector<8x128xf32>
    %42 = tpu.matmul %40, %41, %cst_31 {dimension_numbers = #tpu.dot_dimension_numbers<[1], [0], [0], [1], [0, 0, 1, 1], [], []>} : vector<8x128xf32>, vector<128x128xf32>, vector<8x128xf32> -> vector<8x128xf32>
    %c1_32 = arith.constant 1 : index
    %c0_33 = arith.constant 0 : index
    %43 = vector.load %arg4[%c1_32, %c0_33] : memref<16x256xf32, #tpu.memory_space<vmem>>, vector<1x128xf32>
    %44 = vector.broadcast %43 : vector<1x128xf32> to vector<8x128xf32>
    %45 = arith.addf %42, %44 : vector<8x128xf32>
    %cst_34 = arith.constant 0.000000e+00 : f32
    %46 = vector.broadcast %cst_34 : f32 to vector<8x128xf32>
    %47 = arith.maximumf %45, %46 : vector<8x128xf32>
    %c0_35 = arith.constant 0 : index
    %c256 = arith.constant 256 : index
    %48 = vector.load %arg3[%c0_35, %c256] : memref<128x2304xf32, #tpu.memory_space<vmem>>, vector<128x128xf32>
    %cst_36 = arith.constant dense<0.000000e+00> : vector<8x128xf32>
    %49 = tpu.matmul %47, %48, %cst_36 {dimension_numbers = #tpu.dot_dimension_numbers<[1], [0], [0], [1], [0, 0, 1, 1], [], []>} : vector<8x128xf32>, vector<128x128xf32>, vector<8x128xf32> -> vector<8x128xf32>
    %c2_37 = arith.constant 2 : index
    %c0_38 = arith.constant 0 : index
    %50 = vector.load %arg4[%c2_37, %c0_38] : memref<16x256xf32, #tpu.memory_space<vmem>>, vector<1x128xf32>
    %51 = vector.broadcast %50 : vector<1x128xf32> to vector<8x128xf32>
    %52 = arith.addf %49, %51 : vector<8x128xf32>
    %cst_39 = arith.constant 0.000000e+00 : f32
    %53 = vector.broadcast %cst_39 : f32 to vector<8x128xf32>
    %54 = arith.maximumf %52, %53 : vector<8x128xf32>
    %c0_40 = arith.constant 0 : index
    %c384 = arith.constant 384 : index
    %55 = vector.load %arg3[%c0_40, %c384] : memref<128x2304xf32, #tpu.memory_space<vmem>>, vector<128x128xf32>
    %cst_41 = arith.constant dense<0.000000e+00> : vector<8x128xf32>
    %56 = tpu.matmul %54, %55, %cst_41 {dimension_numbers = #tpu.dot_dimension_numbers<[1], [0], [0], [1], [0, 0, 1, 1], [], []>} : vector<8x128xf32>, vector<128x128xf32>, vector<8x128xf32> -> vector<8x128xf32>
    %c3 = arith.constant 3 : index
    %c0_42 = arith.constant 0 : index
    %57 = vector.load %arg4[%c3, %c0_42] : memref<16x256xf32, #tpu.memory_space<vmem>>, vector<1x128xf32>
    %58 = vector.broadcast %57 : vector<1x128xf32> to vector<8x128xf32>
    %59 = arith.addf %56, %58 : vector<8x128xf32>
    %cst_43 = arith.constant 0.000000e+00 : f32
    %60 = vector.broadcast %cst_43 : f32 to vector<8x128xf32>
    %61 = arith.maximumf %59, %60 : vector<8x128xf32>
    %c0_44 = arith.constant 0 : index
    %c512 = arith.constant 512 : index
    %62 = vector.load %arg3[%c0_44, %c512] : memref<128x2304xf32, #tpu.memory_space<vmem>>, vector<128x512xf32>
    %cst_45 = arith.constant dense<0.000000e+00> : vector<8x512xf32>
    %63 = tpu.matmul %61, %62, %cst_45 {dimension_numbers = #tpu.dot_dimension_numbers<[1], [0], [0], [1], [0, 0, 1, 1], [], []>} : vector<8x128xf32>, vector<128x512xf32>, vector<8x512xf32> -> vector<8x512xf32>
    %64 = vector.extract_strided_slice %63 {offsets = [0, 0], sizes = [8, 256], strides = [1, 1]} : vector<8x512xf32> to vector<8x256xf32>
    %65 = vector.broadcast %24 : vector<1x256xf32> to vector<8x256xf32>
    %66 = arith.addf %64, %65 : vector<8x256xf32>
    %cst_46 = arith.constant 0.000000e+00 : f32
    %67 = vector.broadcast %cst_46 : f32 to vector<8x256xf32>
    %68 = arith.maximumf %66, %67 : vector<8x256xf32>
    %69 = vector.extract_strided_slice %63 {offsets = [0, 256], sizes = [8, 128], strides = [1, 1]} : vector<8x512xf32> to vector<8x128xf32>
    %70 = vector.broadcast %28 : vector<1x128xf32> to vector<8x128xf32>
    %71 = arith.addf %69, %70 : vector<8x128xf32>
    %cst_47 = arith.constant 0.000000e+00 : f32
    %72 = vector.broadcast %cst_47 : f32 to vector<8x128xf32>
    %73 = arith.maximumf %71, %72 : vector<8x128xf32>
    %74 = vector.extract_strided_slice %63 {offsets = [0, 384], sizes = [8, 128], strides = [1, 1]} : vector<8x512xf32> to vector<8x128xf32>
    %75 = vector.broadcast %32 : vector<1x128xf32> to vector<8x128xf32>
    %76 = arith.addf %74, %75 : vector<8x128xf32>
    %cst_48 = arith.constant 0.000000e+00 : f32
    %77 = vector.broadcast %cst_48 : f32 to vector<8x128xf32>
    %78 = arith.maximumf %76, %77 : vector<8x128xf32>
    %79 = vector.extract_strided_slice %68 {offsets = [0, 0], sizes = [8, 128], strides = [1, 1]} : vector<8x256xf32> to vector<8x128xf32>
    %c0_49 = arith.constant 0 : index
    %c1792 = arith.constant 1792 : index
    %80 = vector.load %arg3[%c0_49, %c1792] : memref<128x2304xf32, #tpu.memory_space<vmem>>, vector<128x128xf32>
    %cst_50 = arith.constant dense<0.000000e+00> : vector<8x128xf32>
    %81 = tpu.matmul %79, %80, %cst_50 {dimension_numbers = #tpu.dot_dimension_numbers<[1], [0], [0], [1], [0, 0, 1, 1], [], []>} : vector<8x128xf32>, vector<128x128xf32>, vector<8x128xf32> -> vector<8x128xf32>
    %82 = vector.extract_strided_slice %68 {offsets = [0, 128], sizes = [8, 128], strides = [1, 1]} : vector<8x256xf32> to vector<8x128xf32>
    %c0_51 = arith.constant 0 : index
    %c1920 = arith.constant 1920 : index
    %83 = vector.load %arg3[%c0_51, %c1920] : memref<128x2304xf32, #tpu.memory_space<vmem>>, vector<128x128xf32>
    %cst_52 = arith.constant dense<0.000000e+00> : vector<8x128xf32>
    %84 = tpu.matmul %82, %83, %cst_52 {dimension_numbers = #tpu.dot_dimension_numbers<[1], [0], [0], [1], [0, 0, 1, 1], [], []>} : vector<8x128xf32>, vector<128x128xf32>, vector<8x128xf32> -> vector<8x128xf32>
    %85 = arith.addf %81, %84 : vector<8x128xf32>
    %c10 = arith.constant 10 : index
    %c0_53 = arith.constant 0 : index
    %86 = vector.load %arg4[%c10, %c0_53] : memref<16x256xf32, #tpu.memory_space<vmem>>, vector<1x128xf32>
    %87 = vector.broadcast %86 : vector<1x128xf32> to vector<8x128xf32>
    %88 = arith.addf %85, %87 : vector<8x128xf32>
    %c0_54 = arith.constant 0 : index
    %c2048 = arith.constant 2048 : index
    %89 = vector.load %arg3[%c0_54, %c2048] : memref<128x2304xf32, #tpu.memory_space<vmem>>, vector<128x128xf32>
    %cst_55 = arith.constant dense<0.000000e+00> : vector<8x128xf32>
    %90 = tpu.matmul %73, %89, %cst_55 {dimension_numbers = #tpu.dot_dimension_numbers<[1], [0], [0], [1], [0, 0, 1, 1], [], []>} : vector<8x128xf32>, vector<128x128xf32>, vector<8x128xf32> -> vector<8x128xf32>
    %c11 = arith.constant 11 : index
    %c0_56 = arith.constant 0 : index
    %91 = vector.load %arg4[%c11, %c0_56] : memref<16x256xf32, #tpu.memory_space<vmem>>, vector<1x128xf32>
    %92 = vector.broadcast %91 : vector<1x128xf32> to vector<8x128xf32>
    %93 = arith.addf %90, %92 : vector<8x128xf32>
    %c0_57 = arith.constant 0 : index
    %c2176 = arith.constant 2176 : index
    %94 = vector.load %arg3[%c0_57, %c2176] : memref<128x2304xf32, #tpu.memory_space<vmem>>, vector<128x128xf32>
    %cst_58 = arith.constant dense<0.000000e+00> : vector<8x128xf32>
    %95 = tpu.matmul %78, %94, %cst_58 {dimension_numbers = #tpu.dot_dimension_numbers<[1], [0], [0], [1], [0, 0, 1, 1], [], []>} : vector<8x128xf32>, vector<128x128xf32>, vector<8x128xf32> -> vector<8x128xf32>
    %c12 = arith.constant 12 : index
    %c0_59 = arith.constant 0 : index
    %96 = vector.load %arg4[%c12, %c0_59] : memref<16x256xf32, #tpu.memory_space<vmem>>, vector<1x128xf32>
    %97 = vector.broadcast %96 : vector<1x128xf32> to vector<8x128xf32>
    %98 = arith.addf %95, %97 : vector<8x128xf32>
    %99 = arith.negf %88 : vector<8x128xf32>
    %100 = math.exp %99 : vector<8x128xf32>
    %cst_60 = arith.constant 1.000000e+00 : f32
    %101 = vector.broadcast %cst_60 : f32 to vector<8x128xf32>
    %102 = arith.addf %101, %100 : vector<8x128xf32>
    %103 = arith.divf %101, %102 : vector<8x128xf32>
    %c0_61 = arith.constant 0 : index
    %c0_62 = arith.constant 0 : index
    %104 = vector.load %arg5[%c0_61, %c0_62] : memref<8x384xf32, #tpu.memory_space<vmem>>, vector<8x128xf32>
    tpu.vector_store %arg5[%c0_61, %c0_62], %103 {strides = array<i32>} : memref<8x384xf32, #tpu.memory_space<vmem>>, vector<8x128xf32>,
    %cst_63 = arith.constant dense<0xFF800000> : vector<8xf32>
    %105 = vector.multi_reduction <maximumf>, %93, %cst_63 [1] : vector<8x128xf32> to vector<8xf32>
    %106 = vector.shape_cast %105 : vector<8xf32> to vector<8x1xf32>
    %107 = vector.broadcast %106 : vector<8x1xf32> to vector<8x128xf32>
    %108 = arith.subf %93, %107 : vector<8x128xf32>
    %109 = math.exp %108 : vector<8x128xf32>
    %cst_64 = arith.constant dense<0.000000e+00> : vector<8xf32>
    %110 = vector.multi_reduction <add>, %109, %cst_64 [1] : vector<8x128xf32> to vector<8xf32>
    %111 = vector.shape_cast %110 : vector<8xf32> to vector<8x1xf32>
    %112 = vector.broadcast %111 : vector<8x1xf32> to vector<8x128xf32>
    %113 = arith.divf %109, %112 : vector<8x128xf32>
    %c0_65 = arith.constant 0 : index
    %c128_66 = arith.constant 128 : index
    %114 = vector.load %arg5[%c0_65, %c128_66] : memref<8x384xf32, #tpu.memory_space<vmem>>, vector<8x128xf32>
    tpu.vector_store %arg5[%c0_65, %c128_66], %113 {strides = array<i32>} : memref<8x384xf32, #tpu.memory_space<vmem>>, vector<8x128xf32>,
    %cst_67 = arith.constant dense<0xFF800000> : vector<8xf32>
    %115 = vector.multi_reduction <maximumf>, %98, %cst_67 [1] : vector<8x128xf32> to vector<8xf32>
    %116 = vector.shape_cast %115 : vector<8xf32> to vector<8x1xf32>
    %117 = vector.broadcast %116 : vector<8x1xf32> to vector<8x128xf32>
    %118 = arith.subf %98, %117 : vector<8x128xf32>
    %119 = math.exp %118 : vector<8x128xf32>
    %cst_68 = arith.constant dense<0.000000e+00> : vector<8xf32>
    %120 = vector.multi_reduction <add>, %119, %cst_68 [1] : vector<8x128xf32> to vector<8xf32>
    %121 = vector.shape_cast %120 : vector<8xf32> to vector<8x1xf32>
    %122 = vector.broadcast %121 : vector<8x1xf32> to vector<8x128xf32>
    %123 = arith.divf %119, %122 : vector<8x128xf32>
    %c0_69 = arith.constant 0 : index
    %c256_70 = arith.constant 256 : index
    %124 = vector.load %arg5[%c0_69, %c256_70] : memref<8x384xf32, #tpu.memory_space<vmem>>, vector<8x128xf32>
    tpu.vector_store %arg5[%c0_69, %c256_70], %123 {strides = array<i32>} : memref<8x384xf32, #tpu.memory_space<vmem>>, vector<8x128xf32>,
    return
  }
  func.func @transform_0(%arg0: i32) -> (i32, i32) {
    %c0_i32 = arith.constant 0 : i32
    %c0_i32_0 = arith.constant 0 : i32
    return %arg0, %c0_i32 : i32, i32
  }
  func.func @transform_1(%arg0: i32) -> (i32, i32) {
    %c0_i32 = arith.constant 0 : i32
    %c0_i32_0 = arith.constant 0 : i32
    %c0_i32_1 = arith.constant 0 : i32
    return %c0_i32, %c0_i32_0 : i32, i32
  }
  func.func @transform_2(%arg0: i32) -> (i32, i32) {
    %c0_i32 = arith.constant 0 : i32
    %c0_i32_0 = arith.constant 0 : i32
    %c0_i32_1 = arith.constant 0 : i32
    return %c0_i32, %c0_i32_0 : i32, i32
  }
  func.func @transform_3(%arg0: i32) -> (i32, i32) {
    %c0_i32 = arith.constant 0 : i32
    %c0_i32_0 = arith.constant 0 : i32
    %c0_i32_1 = arith.constant 0 : i32
    return %c0_i32, %c0_i32_0 : i32, i32
  }
  func.func @transform_4(%arg0: i32) -> (i32, i32) {
    %c0_i32 = arith.constant 0 : i32
    %c0_i32_0 = arith.constant 0 : i32
    return %arg0, %c0_i32 : i32, i32
  }
}

</mosaic_0001>

<bundles_post_ra>
// kernel: encoder_forward.1
= control target key start
LH: loop header
LB: loop body
LE: loop exit
PB: predicated region body
PF: predicated region fallthrough
CT: control target
= control target key end

     0   :  { %9 = vsyncpa [#allocation3], 0  ;;  %s2470_s0 = inlined_call_operand.vmem [shape: f32[8,128], index: 0, kind: input, shape index: {}]   ;;  %s2471_s1 = inlined_call_operand.vmem [shape: f32[8,128], index: 1, kind: input, shape index: {}]   ;;  %s2472_s2 = inlined_call_operand.hbm [shape: f32[128,2304], index: 2, kind: input, shape index: {}]   ;;  %s2473_s3 = inlined_call_operand.hbm [shape: f32[16,256], index: 3, kind: input, shape index: {}]   ;;  %s2474_s4 = inlined_call_operand.vmem [shape: f32[8,384], index: 4, kind: output, shape index: {}]  }
   0x1   :  { %10 = vsyncpa [#allocation5], 0  ;;  %s2172_s15 = smov [#allocation2]  }
   0x2   :  { %s20_s16 = sshll.u32 %s2172_s15, 4  ;;  %s21_s16 = int_to_ptr.vmem [resolvable:$true] %s20_s16 }
   0x3   :  { %s2136_s17 = scalar_lea.vmem %s21_s16, 36864  ;;  %p2141_p1 = scmp.lt.s32.totalorder %s21_s16, %s21_s16 }
   0x4   :  { %p2137_p0 = scmp.ne.s32.totalorder %s21_s16, %s2136_s17  ;;  %p2142_p2 = scmp.lt.s32.totalorder %s2136_s17, %s2136_s17 }
   0x6   :  { %p2143_p3 = por %p2142_p2, %p2141_p1 }
   0x8   :  { %p2144_p4 = pnand %p2143_p3, %p2137_p0 }
   0xa   :  { %2147 = shalt.err (!%p2144_p4)
}
   0xb   :  { %s2173_s18 = smov 2304   ;;  %s2174_s19 = smov 144  }
   0xc   :  { %26 = dma.hbm_to_vmem [thread:$0]  %s2472_s2, 36864, %s21_s16, [#allocation3], %s2173_s18, %s2173_s18, %s2174_s19  }
   0xd   :  { %s2175_s22 = smov [#allocation4]  }
   0xe   :  { %s32_s23 = sshll.u32 %s2175_s22, 4  ;;  %s33_s23 = int_to_ptr.vmem [resolvable:$true] %s32_s23 }
   0xf   :  { %s2156_s24 = scalar_lea.vmem %s33_s23, 512  ;;  %p2161_p6 = scmp.lt.s32.totalorder %s33_s23, %s33_s23 }
  0x10   :  { %p2157_p5 = scmp.ne.s32.totalorder %s33_s23, %s2156_s24  ;;  %p2162_p7 = scmp.lt.s32.totalorder %s2156_s24, %s2156_s24 }
  0x12   :  { %p2163_p8 = por %p2162_p7, %p2161_p6 }
  0x14   :  { %p2164_p9 = pnand %p2163_p8, %p2157_p5 }
  0x16   :  { %2167 = shalt.err (!%p2164_p9)
}
  0x17   :  { %s2176_s25 = smov 256   ;;  %s2177_s26 = smov 16  }
  0x18   :  { %38 = dma.hbm_to_vmem [thread:$0]  %s2473_s3, 512, %s33_s23, [#allocation5], %s2176_s25, %s2176_s25, %s2177_s26  }
  0x19   :  { %2168 = dma.done.wait [#allocation3], 36864  }
  0x1a   :  { %2169 = vsyncadd [#allocation3], 4294930432 }
  0x1b   :  { %2170 = dma.done.wait [#allocation5], 512  }
  0x1c   :  { %2171 = vsyncadd [#allocation5], 4294966784  ;;  %v2178_v0 = vmov 0.0   ;;  %vm2179_vm0 = vmmov 0   ;;  %v68_v1 = vld [vmem:[#allocation2 + $0x8b0] sm:$0xff]  ;;  %v67_v2 = vld [vmem:[#allocation2 + $0x820] sm:$0xff] }
  0x1d   :  { %1688 = vmatprep.subr.mxu0 %v2178_v0  ;;  %1720 = vmatprep.mubr.msk.f32.mxu0 %vm2179_vm0, %v2178_v0  ;;  %v66_v3 = vld [vmem:[#allocation2 + $0x790] sm:$0xff]  ;;  %v65_v4 = vld [vmem:[#allocation2 + $0x700] sm:$0xff]  ;;  %v156_v5 = vld [vmem:[#allocation2 + $0x8b8] sm:$0xff] }
  0x1e   :  { %1723 = vmatprep.subr.mxu1 %v2178_v0  ;;  %1755 = vmatprep.mubr.msk.f32.mxu1 %vm2179_vm0, %v2178_v0  ;;  %v64_v6 = vld [vmem:[#allocation2 + $0x670] sm:$0xff]  ;;  %v155_v7 = vld [vmem:[#allocation2 + $0x828] sm:$0xff]  ;;  %v154_v8 = vld [vmem:[#allocation2 + $0x798] sm:$0xff] }
  0x1f   :  { %1689 = vmatpush3.msra.mxu0 %v68_v1  ;;  %1724 = vmatpush3.msra.mxu1 %v156_v5  ;;  %v63_v9 = vld [vmem:[#allocation2 + $0x5e0] sm:$0xff]  ;;  %v153_v10 = vld [vmem:[#allocation2 + $0x708] sm:$0xff]  ;;  %v62_v11 = vld [vmem:[#allocation2 + $0x550] sm:$0xff] }
  0x20   :  { %1690 = vmatprep.subr.mxu0 %v2178_v0  ;;  %1725 = vmatprep.subr.mxu1 %v2178_v0  ;;  %v152_v12 = vld [vmem:[#allocation2 + $0x678] sm:$0xff]  ;;  %v61_v13 = vld [vmem:[#allocation2 + $0x4c0] sm:$0xff]  ;;  %v151_v14 = vld [vmem:[#allocation2 + $0x5e8] sm:$0xff] }
  0x21   :  { %1691 = vmatpush3.msra.mxu0 %v67_v2  ;;  %1726 = vmatpush3.msra.mxu1 %v155_v7  ;;  %v60_v15 = vld [vmem:[#allocation2 + $0x430] sm:$0xff]  ;;  %v150_v16 = vld [vmem:[#allocation2 + $0x558] sm:$0xff]  ;;  %v59_v17 = vld [vmem:[#allocation2 + $0x3a0] sm:$0xff] }
  0x22   :  { %1692 = vmatprep.subr.mxu0 %v2178_v0  ;;  %1727 = vmatprep.subr.mxu1 %v2178_v0  ;;  %v149_v18 = vld [vmem:[#allocation2 + $0x4c8] sm:$0xff]  ;;  %v58_v19 = vld [vmem:[#allocation2 + $0x310] sm:$0xff]  ;;  %v148_v20 = vld [vmem:[#allocation2 + $0x438] sm:$0xff] }
  0x23   :  { %1693 = vmatpush3.msra.mxu0 %v66_v3  ;;  %1728 = vmatpush3.msra.mxu1 %v154_v8  ;;  %v57_v21 = vld [vmem:[#allocation2 + $0x280] sm:$0xff]  ;;  %v147_v22 = vld [vmem:[#allocation2 + $0x3a8] sm:$0xff]  ;;  %v56_v23 = vld [vmem:[#allocation2 + $0x1f0] sm:$0xff] }
  0x24   :  { %1694 = vmatprep.subr.mxu0 %v2178_v0  ;;  %1729 = vmatprep.subr.mxu1 %v2178_v0  ;;  %v146_v24 = vld [vmem:[#allocation2 + $0x318] sm:$0xff]  ;;  %v55_v25 = vld [vmem:[#allocation2 + $0x160] sm:$0xff]  ;;  %v145_v26 = vld [vmem:[#allocation2 + $0x288] sm:$0xff] }
  0x25   :  { %1695 = vmatpush3.msra.mxu0 %v65_v4  ;;  %1730 = vmatpush3.msra.mxu1 %v153_v10  ;;  %v54_v27 = vld [vmem:[#allocation2 + $0xd0] sm:$0xff]  ;;  %v144_v28 = vld [vmem:[#allocation2 + $0x1f8] sm:$0xff]  ;;  %v53_v29 = vld [vmem:[#allocation2 + $0x40] sm:$0xff] }
  0x26   :  { %1696 = vmatprep.subr.mxu0 %v2178_v0  ;;  %1731 = vmatprep.subr.mxu1 %v2178_v0  ;;  %v45_v30 = vld [vmem:[%s2471_s1] sm:$0x1]  ;;  %v143_v31 = vld [vmem:[#allocation2 + $0x168] sm:$0xff]  ;;  %v142_v32 = vld [vmem:[#allocation2 + $0xd8] sm:$0xff] }
  0x27   :  { %1697 = vmatpush3.msra.mxu0 %v64_v6  ;;  %1732 = vmatpush3.msra.mxu1 %v152_v12  ;;  %v141_v33 = vld [vmem:[#allocation2 + $0x48] sm:$0xff]  ;;  %v46_v34 = vld [vmem:[%s2471_s1 + $0x1] sm:$0x1]  ;;  %v360_v35 = vld [vmem:[#allocation2 + $0x8d0] sm:$0xff] }
  0x28   :  { %1698 = vmatprep.subr.mxu0 %v2178_v0  ;;  %1733 = vmatprep.subr.mxu1 %v2178_v0  ;;  %v359_v36 = vld [vmem:[#allocation2 + $0x840] sm:$0xff]  ;;  %v358_v37 = vld [vmem:[#allocation2 + $0x7b0] sm:$0xff]  ;;  %v260_v51 = vld [vmem:[#allocation2 + $0x8c8] sm:$0xff] }
  0x29   :  { %1699 = vmatpush3.msra.mxu0 %v63_v9  ;;  %1734 = vmatpush3.msra.mxu1 %v151_v14  ;;  %v357_v38 = vld [vmem:[#allocation2 + $0x720] sm:$0xff]  ;;  %v356_v39 = vld [vmem:[#allocation2 + $0x690] sm:$0xff]  ;;  %v258_v53 = vld [vmem:[#allocation2 + $0x838] sm:$0xff] }
  0x2a   :  { %1700 = vmatprep.subr.mxu0 %v2178_v0  ;;  %1735 = vmatprep.subr.mxu1 %v2178_v0  ;;  %v355_v40 = vld [vmem:[#allocation2 + $0x600] sm:$0xff]  ;;  %v354_v41 = vld [vmem:[#allocation2 + $0x570] sm:$0xff]  ;;  %v256_v55 = vld [vmem:[#allocation2 + $0x7a8] sm:$0xff] }
  0x2b   :  { %1701 = vmatpush3.msra.mxu0 %v62_v11  ;;  %1736 = vmatpush3.msra.mxu1 %v150_v16  ;;  %v353_v42 = vld [vmem:[#allocation2 + $0x4e0] sm:$0xff]  ;;  %v352_v43 = vld [vmem:[#allocation2 + $0x450] sm:$0xff]  ;;  %v254_v57 = vld [vmem:[#allocation2 + $0x718] sm:$0xff] }
  0x2c   :  { %1702 = vmatprep.subr.mxu0 %v2178_v0  ;;  %1737 = vmatprep.subr.mxu1 %v2178_v0  ;;  %v351_v44 = vld [vmem:[#allocation2 + $0x3c0] sm:$0xff]  ;;  %v350_v45 = vld [vmem:[#allocation2 + $0x330] sm:$0xff]  ;;  %v252_v59 = vld [vmem:[#allocation2 + $0x688] sm:$0xff] }
  0x2d   :  { %1703 = vmatpush3.msra.mxu0 %v61_v13  ;;  %1738 = vmatpush3.msra.mxu1 %v149_v18  ;;  %v349_v46 = vld [vmem:[#allocation2 + $0x2a0] sm:$0xff]  ;;  %v348_v47 = vld [vmem:[#allocation2 + $0x210] sm:$0xff]  ;;  %v250_v61 = vld [vmem:[#allocation2 + $0x5f8] sm:$0xff] }
  0x2e   :  { %1704 = vmatprep.subr.mxu0 %v2178_v0  ;;  %1739 = vmatprep.subr.mxu1 %v2178_v0  ;;  %v347_v48 = vld [vmem:[#allocation2 + $0x180] sm:$0xff]  ;;  %v346_v49 = vld [vmem:[#allocation2 + $0xf0] sm:$0xff]  ;;  %v248_v63 = vld [vmem:[#allocation2 + $0x568] sm:$0xff] }
  0x2f   :  { %1705 = vmatpush3.msra.mxu0 %v60_v15  ;;  %1740 = vmatpush3.msra.mxu1 %v148_v20  ;;  %v345_v50 = vld [vmem:[#allocation2 + $0x60] sm:$0xff]  ;;  %v257_v54 = vld [vmem:[#allocation2 + $0x830] sm:$0xff]  ;;  %v246_v2 = vld [vmem:[#allocation2 + $0x4d8] sm:$0xff] }
  0x30   :  { %1706 = vmatprep.subr.mxu0 %v2178_v0  ;;  %1741 = vmatprep.subr.mxu1 %v2178_v0  ;;  %v259_v52 = vld [vmem:[#allocation2 + $0x8c0] sm:$0xff]  ;;  %v253_v58 = vld [vmem:[#allocation2 + $0x710] sm:$0xff]  ;;  %v244_v4 = vld [vmem:[#allocation2 + $0x448] sm:$0xff] }
  0x31   :  { %1707 = vmatpush3.msra.mxu0 %v59_v17  ;;  %1742 = vmatpush3.msra.mxu1 %v147_v22  ;;  %v255_v56 = vld [vmem:[#allocation2 + $0x7a0] sm:$0xff]  ;;  %v249_v62 = vld [vmem:[#allocation2 + $0x5f0] sm:$0xff]  ;;  %v242_v6 = vld [vmem:[#allocation2 + $0x3b8] sm:$0xff] }
  0x32   :  { %1708 = vmatprep.subr.mxu0 %v2178_v0  ;;  %1743 = vmatprep.subr.mxu1 %v2178_v0  ;;  %v251_v60 = vld [vmem:[#allocation2 + $0x680] sm:$0xff]  ;;  %v245_v3 = vld [vmem:[#allocation2 + $0x4d0] sm:$0xff]  ;;  %v240_v8 = vld [vmem:[#allocation2 + $0x328] sm:$0xff] }
  0x33   :  { %1709 = vmatpush3.msra.mxu0 %v58_v19  ;;  %1744 = vmatpush3.msra.mxu1 %v146_v24  ;;  %v247_v1 = vld [vmem:[#allocation2 + $0x560] sm:$0xff]  ;;  %v241_v7 = vld [vmem:[#allocation2 + $0x3b0] sm:$0xff]  ;;  %v238_v12 = vld [vmem:[#allocation2 + $0x298] sm:$0xff] }
  0x34   :  { %1710 = vmatprep.subr.mxu0 %v2178_v0  ;;  %1745 = vmatprep.subr.mxu1 %v2178_v0  ;;  %v243_v5 = vld [vmem:[#allocation2 + $0x440] sm:$0xff]  ;;  %v48_v10 = vld [vmem:[#allocation4 + $0x15] ss:$0 sm:$0xff]  ;;  %v236_v15 = vld [vmem:[#allocation2 + $0x208] sm:$0xff] }
  0x35   :  { %1711 = vmatpush3.msra.mxu0 %v57_v21  ;;  %1746 = vmatpush3.msra.mxu1 %v145_v26  ;;  %v47_v9 = vld [vmem:[%s2471_s1 + $0x2] sm:$0x1]  ;;  %v237_v13 = vld [vmem:[#allocation2 + $0x290] sm:$0xff]  ;;  %v50_v16 = vld [vmem:[#allocation4 + $0x7] ss:$0 sm:$0xff] }
  0x36   :  { %1712 = vmatprep.subr.mxu0 %v2178_v0  ;;  %1747 = vmatprep.subr.mxu1 %v2178_v0  ;;  %v239_v11 = vld [vmem:[#allocation2 + $0x320] sm:$0xff]  ;;  %v49_v14 = vmul.f32 %v48_v10, %v47_v9  ;;  %v234_v18 = vld [vmem:[#allocation2 + $0x178] sm:$0xff]  ;;  %v233_v19 = vld [vmem:[#allocation2 + $0x170] sm:$0xff] }
  0x37   :  { %1713 = vmatpush3.msra.mxu0 %v56_v23  ;;  %1748 = vmatpush3.msra.mxu1 %v144_v28  ;;  %v235_v17 = vld [vmem:[#allocation2 + $0x200] sm:$0xff]  ;;  %v232_v21 = vld [vmem:[#allocation2 + $0xe8] sm:$0xff]  ;;  %v230_v23 = vld [vmem:[#allocation2 + $0x58] sm:$0xff] }
  0x38   :  { %1714 = vmatprep.subr.mxu0 %v2178_v0  ;;  %1749 = vmatprep.subr.mxu1 %v2178_v0  ;;  %v51_v20 = vadd.f32 %v50_v16, %v49_v14  ;;  %v231_v22 = vld [vmem:[#allocation2 + $0xe0] sm:$0xff]  ;;  %v229_v24 = vld [vmem:[#allocation2 + $0x50] sm:$0xff]  ;;  %v447_v26 = vld [vmem:[#allocation2 + $0x8d8] sm:$0xff] }
  0x39   :  { %1715 = vmatpush3.msra.mxu0 %v55_v25  ;;  %1750 = vmatpush3.msra.mxu1 %v143_v31  ;;  %v445_v28 = vld [vmem:[#allocation2 + $0x7b8] sm:$0xff]  ;;  %v442_v31 = vld [vmem:[#allocation2 + $0x608] sm:$0xff] }
  0x3a   :  { %1716 = vmatprep.subr.mxu0 %v2178_v0  ;;  %1751 = vmatprep.subr.mxu1 %v2178_v0  ;;  %v52_v25 = vmax.f32 %v51_v20, 0.0  ;;  %v620_v9 = vld [vmem:[#allocation2 + $0x6c8] sm:$0xff]  ;;  %v619_v10 = vld [vmem:[#allocation2 + $0x638] sm:$0xff] }
  0x3b   :  { %1717 = vmatpush3.msra.mxu0 %v54_v27  ;;  %1752 = vmatpush3.msra.mxu1 %v142_v32  ;;  %v446_v27 = vld [vmem:[#allocation2 + $0x848] sm:$0xff]  ;;  %v441_v32 = vld [vmem:[#allocation2 + $0x578] sm:$0xff] }
  0x3c   :  { %1718 = vmatprep.subr.mxu0 %v2178_v0  ;;  %1753 = vmatprep.subr.mxu1 %v2178_v0  ;;  %v615_v14 = vld [vmem:[#allocation2 + $0x3f8] sm:$0xff] }
  0x3d   :  { %1719 = vmatpush3.msra.mxu0 %v53_v29  ;;  %1754 = vmatpush3.msra.mxu1 %v141_v33  ;;  %v444_v29 = vld [vmem:[#allocation2 + $0x728] sm:$0xff]  ;;  %v613_v16 = vld [vmem:[#allocation2 + $0x2d8] sm:$0xff] }
  0x3e   :  { %1721 = vmatmul.mubr.f32.vlgmr.msra.gmra.mxu0 %v45_v30  ;;  %1756 = vmatmul.mubr.f32.vlgmr.msra.gmra.mxu1 %v46_v34  ;;  %v443_v30 = vld [vmem:[#allocation2 + $0x698] sm:$0xff]  ;;  %v440_v33 = vld [vmem:[#allocation2 + $0x4e8] sm:$0xff] }
  0x3f   :  { %338 = vmatprep.mubr.f32.mxu0 %v2178_v0  ;;  %1758 = vmatprep.subr.mxu1 %v2178_v0  ;;  %v439_v34 = vld [vmem:[#allocation2 + $0x458] sm:$0xff] }
  0x40   :  { %1759 = vmatpush3.msra.mxu1 %v360_v35  ;;  %1790 = vmatprep.mubr.msk.f32.mxu1 %vm2179_vm0, %v2178_v0  ;;  %v438_v35 = vld [vmem:[#allocation2 + $0x3c8] sm:$0xff]  ;;  %v609_v20 = vld [vmem:[#allocation2 + $0x98] sm:$0xff] }
  0x41   :  { %1760 = vmatprep.subr.mxu1 %v2178_v0  ;;  %274 = vmatprep.subr.mxu0 %v260_v51 }
  0x42   :  { %1761 = vmatpush3.msra.mxu1 %v359_v36  ;;  %275 = vmatpush1.msra.mxu0 %v259_v52  ;;  %v437_v36 = vld [vmem:[#allocation2 + $0x338] sm:$0xff]  ;;  %v533_v52 = vld [vmem:[#allocation2 + $0x750] sm:$0xff] }
  0x43   :  { %1762 = vmatprep.subr.mxu1 %v2178_v0  ;;  %276 = vmatprep.subr.mxu0 %v258_v53 }
  0x44   :  { %1763 = vmatpush3.msra.mxu1 %v358_v37  ;;  %277 = vmatpush1.msra.mxu0 %v257_v54  ;;  %v436_v37 = vld [vmem:[#allocation2 + $0x2a8] sm:$0xff] }
  0x45   :  { %1764 = vmatprep.subr.mxu1 %v2178_v0  ;;  %278 = vmatprep.subr.mxu0 %v256_v55  ;;  %v532_v55 = vld [vmem:[#allocation2 + $0x6c0] sm:$0xff] }
  0x46   :  { %1765 = vmatpush3.msra.mxu1 %v357_v38  ;;  %279 = vmatpush1.msra.mxu0 %v255_v56  ;;  %v435_v38 = vld [vmem:[#allocation2 + $0x218] sm:$0xff]  ;;  %v531_v56 = vld [vmem:[#allocation2 + $0x630] sm:$0xff] }
  0x47   :  { %1766 = vmatprep.subr.mxu1 %v2178_v0  ;;  %280 = vmatprep.subr.mxu0 %v254_v57  ;;  %v530_v57 = vld [vmem:[#allocation2 + $0x5a0] sm:$0xff] }
  0x48   :  { %1767 = vmatpush3.msra.mxu1 %v356_v39  ;;  %281 = vmatpush1.msra.mxu0 %v253_v58  ;;  %v434_v39 = vld [vmem:[#allocation2 + $0x188] sm:$0xff]  ;;  %v529_v58 = vld [vmem:[#allocation2 + $0x510] sm:$0xff] }
  0x49   :  { %1768 = vmatprep.subr.mxu1 %v2178_v0  ;;  %282 = vmatprep.subr.mxu0 %v252_v59  ;;  %v528_v59 = vld [vmem:[#allocation2 + $0x480] sm:$0xff] }
  0x4a   :  { %1769 = vmatpush3.msra.mxu1 %v355_v40  ;;  %283 = vmatpush1.msra.mxu0 %v251_v60  ;;  %v433_v40 = vld [vmem:[#allocation2 + $0xf8] sm:$0xff]  ;;  %v527_v60 = vld [vmem:[#allocation2 + $0x3f0] sm:$0xff] }
  0x4b   :  { %1770 = vmatprep.subr.mxu1 %v2178_v0  ;;  %284 = vmatprep.subr.mxu0 %v250_v61  ;;  %v526_v61 = vld [vmem:[#allocation2 + $0x360] sm:$0xff] }
  0x4c   :  { %1771 = vmatpush3.msra.mxu1 %v354_v41  ;;  %285 = vmatpush1.msra.mxu0 %v249_v62  ;;  %v432_v41 = vld [vmem:[#allocation2 + $0x68] sm:$0xff]  ;;  %v525_v62 = vld [vmem:[#allocation2 + $0x2d0] sm:$0xff] }
  0x4d   :  { %1772 = vmatprep.subr.mxu1 %v2178_v0  ;;  %286 = vmatprep.subr.mxu0 %v248_v63  ;;  %v524_v63 = vld [vmem:[#allocation2 + $0x240] sm:$0xff] }
  0x4e   :  { %1773 = vmatpush3.msra.mxu1 %v353_v42  ;;  %287 = vmatpush1.msra.mxu0 %v247_v1  ;;  %v69_v42 = vld [vmem:[#allocation4 + $0x10] ss:$0 sm:$0xff] }
  0x4f   :  { %1774 = vmatprep.subr.mxu1 %v2178_v0  ;;  %288 = vmatprep.subr.mxu0 %v246_v2  ;;  %v523_v1 = vld [vmem:[#allocation2 + $0x1b0] sm:$0xff]  ;;  %v522_v2 = vld [vmem:[#allocation2 + $0x120] sm:$0xff] }
  0x50   :  { %1775 = vmatpush3.msra.mxu1 %v352_v43  ;;  %289 = vmatpush1.msra.mxu0 %v245_v3  ;;  %v521_v3 = vld [vmem:[#allocation2 + $0x90] sm:$0xff] }
  0x51   :  { %1776 = vmatprep.subr.mxu1 %v2178_v0  ;;  %290 = vmatprep.subr.mxu0 %v244_v4  ;;  %v520_v4 = vld [vmem:[#allocation2] sm:$0xff] }
  0x52   :  { %1777 = vmatpush3.msra.mxu1 %v351_v44  ;;  %291 = vmatpush1.msra.mxu0 %v243_v5  ;;  %v519_v5 = vld [vmem:[%s2470_s0] sm:$0xff] }
  0x53   :  { %1778 = vmatprep.subr.mxu1 %v2178_v0  ;;  %292 = vmatprep.subr.mxu0 %v242_v6  ;;  %v623_v6 = vld [vmem:[#allocation2 + $0x878] sm:$0xff] }
  0x54   :  { %1779 = vmatpush3.msra.mxu1 %v350_v45  ;;  %293 = vmatpush1.msra.mxu0 %v241_v7  ;;  %v622_v7 = vld [vmem:[#allocation2 + $0x7e8] sm:$0xff] }
  0x55   :  { %1780 = vmatprep.subr.mxu1 %v2178_v0  ;;  %294 = vmatprep.subr.mxu0 %v240_v8  ;;  %v621_v8 = vld [vmem:[#allocation2 + $0x758] sm:$0xff] }
  0x56   :  { %1781 = vmatpush3.msra.mxu1 %v349_v46  ;;  %295 = vmatpush1.msra.mxu0 %v239_v11  ;;  %v618_v11 = vld [vmem:[#allocation2 + $0x5a8] sm:$0xff] }
  0x57   :  { %1782 = vmatprep.subr.mxu1 %v2178_v0  ;;  %296 = vmatprep.subr.mxu0 %v238_v12  ;;  %v617_v12 = vld [vmem:[#allocation2 + $0x518] sm:$0xff] }
  0x58   :  { %1783 = vmatpush3.msra.mxu1 %v348_v47  ;;  %297 = vmatpush1.msra.mxu0 %v237_v13  ;;  %v535_v47 = vld [vmem:[#allocation2 + $0x870] sm:$0xff]  ;;  %v616_v13 = vld [vmem:[#allocation2 + $0x488] sm:$0xff] }
  0x59   :  { %1784 = vmatprep.subr.mxu1 %v2178_v0  ;;  %298 = vmatprep.subr.mxu0 %v236_v15  ;;  %v614_v15 = vld [vmem:[#allocation2 + $0x368] sm:$0xff] }
  0x5a   :  { %1785 = vmatpush3.msra.mxu1 %v347_v48  ;;  %299 = vmatpush1.msra.mxu0 %v235_v17  ;;  %v157_v48 = vld [vmem:[#allocation4 + $0x11] ss:$0 sm:$0xff]  ;;  %v612_v17 = vld [vmem:[#allocation2 + $0x248] sm:$0xff] }
  0x5b   :  { %1786 = vmatprep.subr.mxu1 %v2178_v0  ;;  %300 = vmatprep.subr.mxu0 %v234_v18  ;;  %v611_v18 = vld [vmem:[#allocation2 + $0x1b8] sm:$0xff] }
  0x5c   :  { %1787 = vmatpush3.msra.mxu1 %v346_v49  ;;  %301 = vmatpush1.msra.mxu0 %v233_v19  ;;  %v534_v49 = vld [vmem:[#allocation2 + $0x7e0] sm:$0xff]  ;;  %v610_v19 = vld [vmem:[#allocation2 + $0x128] sm:$0xff] }
  0x5d   :  { %1788 = vmatprep.subr.mxu1 %v2178_v0  ;;  %302 = vmatprep.subr.mxu0 %v232_v21  ;;  %v608_v21 = vld [vmem:[#allocation2 + $0x8] sm:$0xff] }
  0x5e   :  { %1789 = vmatpush3.msra.mxu1 %v345_v50  ;;  %303 = vmatpush1.msra.mxu0 %v231_v22  ;;  %v711_v22 = vld [vmem:[#allocation2 + $0x880] sm:$0xff] }
  0x5f   :  { %1828 = vmatprep.subr.mxu1 %v2178_v0  ;;  %304 = vmatprep.subr.mxu0 %v230_v23  ;;  %v710_v23 = vld [vmem:[#allocation2 + $0x7f0] sm:$0xff] }
  0x60   :  { %305 = vmatpush1.msra.mxu0 %v229_v24  ;;  %v709_v24 = vld [vmem:[#allocation2 + $0x760] sm:$0xff] }
  0x61   :  { %1793 = vmatprep.subr.mxu0 %v2178_v0  ;;  %339 = vmatmul.mubr.f32.vlgmr.msra.gmra.mxu0 %v52_v25  ;;  %v708_v25 = vld [vmem:[#allocation2 + $0x6d0] sm:$0xff] }
  0x62   :  { %1794 = vmatpush3.msra.mxu0 %v447_v26  ;;  %1825 = vmatprep.mubr.msk.f32.mxu0 %vm2179_vm0, %v2178_v0  ;;  %v707_v26 = vld [vmem:[#allocation2 + $0x640] sm:$0xff] }
  0x63   :  { %1795 = vmatprep.subr.mxu0 %v2178_v0 }
  0x64   :  { %1796 = vmatpush3.msra.mxu0 %v446_v27  ;;  %v706_v27 = vld [vmem:[#allocation2 + $0x5b0] sm:$0xff] }
  0x65   :  { %1797 = vmatprep.subr.mxu0 %v2178_v0 }
  0x66   :  { %1798 = vmatpush3.msra.mxu0 %v445_v28  ;;  %v705_v28 = vld [vmem:[#allocation2 + $0x520] sm:$0xff] }
  0x67   :  { %1799 = vmatprep.subr.mxu0 %v2178_v0 }
  0x68   :  { %1800 = vmatpush3.msra.mxu0 %v444_v29  ;;  %v704_v29 = vld [vmem:[#allocation2 + $0x490] sm:$0xff] }
  0x69   :  { %1801 = vmatprep.subr.mxu0 %v2178_v0 }
  0x6a   :  { %1802 = vmatpush3.msra.mxu0 %v443_v30  ;;  %v703_v30 = vld [vmem:[#allocation2 + $0x400] sm:$0xff] }
  0x6b   :  { %1803 = vmatprep.subr.mxu0 %v2178_v0 }
  0x6c   :  { %1804 = vmatpush3.msra.mxu0 %v442_v31  ;;  %v702_v31 = vld [vmem:[#allocation2 + $0x370] sm:$0xff] }
  0x6d   :  { %1805 = vmatprep.subr.mxu0 %v2178_v0 }
  0x6e   :  { %1806 = vmatpush3.msra.mxu0 %v441_v32  ;;  %v701_v32 = vld [vmem:[#allocation2 + $0x2e0] sm:$0xff] }
  0x6f   :  { %1807 = vmatprep.subr.mxu0 %v2178_v0 }
  0x70   :  { %1808 = vmatpush3.msra.mxu0 %v440_v33  ;;  %v700_v33 = vld [vmem:[#allocation2 + $0x250] sm:$0xff] }
  0x71   :  { %1809 = vmatprep.subr.mxu0 %v2178_v0 }
  0x72   :  { %1810 = vmatpush3.msra.mxu0 %v439_v34  ;;  %v699_v34 = vld [vmem:[#allocation2 + $0x1c0] sm:$0xff] }
  0x73   :  { %1811 = vmatprep.subr.mxu0 %v2178_v0 }
  0x74   :  { %1812 = vmatpush3.msra.mxu0 %v438_v35 }
  0x75   :  { %1813 = vmatprep.subr.mxu0 %v2178_v0 }
  0x76   :  { %1814 = vmatpush3.msra.mxu0 %v437_v36 }
  0x77   :  { %1815 = vmatprep.subr.mxu0 %v2178_v0 }
  0x78   :  { %1816 = vmatpush3.msra.mxu0 %v436_v37 }
  0x79   :  { %1817 = vmatprep.subr.mxu0 %v2178_v0 }
  0x7a   :  { %1818 = vmatpush3.msra.mxu0 %v435_v38 }
  0x7b   :  { %1819 = vmatprep.subr.mxu0 %v2178_v0 }
  0x7c   :  { %1820 = vmatpush3.msra.mxu0 %v434_v39 }
  0x7d   :  { %1821 = vmatprep.subr.mxu0 %v2178_v0 }
  0x7e   :  { %1822 = vmatpush3.msra.mxu0 %v433_v40 }
  0x7f   :  { %1823 = vmatprep.subr.mxu0 %v2178_v0 }
  0x80   :  { %1824 = vmatpush3.msra.mxu0 %v432_v41  ;;  %v536_v41 = vld [vmem:[#allocation4] ss:$0 sm:$0xff] }
  0x81   :  { %1863 = vmatprep.subr.mxu0 %v2178_v0 }
  0xfe   :  { %v136_v43 = vpop.f32.mrf.mxu0  ;;  %v224_v50 = vpop.f32.mrf.mxu1 }
  0xff   :  { %v137_v44 = vadd.f32 %v136_v43, %v69_v42  ;;  %v225_v51 = vadd.f32 %v224_v50, %v157_v48  ;;  %v696_v48 = vld [vmem:[#allocation2 + $0x10] sm:$0xff]  ;;  %v798_v50 = vld [vmem:[#allocation2 + $0x7f8] sm:$0xff] }
 0x100   :  { %v1722_v45 = vpop.f32.mrf.mxu0  ;;  %v1757_v53 = vpop.f32.mrf.mxu1 }
 0x101   :  { %v140_v46 = vmax.f32 %v137_v44, 0.0  ;;  %v228_v54 = vmax.f32 %v225_v51, 0.0  ;;  %v797_v51 = vld [vmem:[#allocation2 + $0x768] sm:$0xff] }
 0x102   :  { %v795_v53 = vld [vmem:[#allocation2 + $0x648] sm:$0xff] }
 0x103   :  { %1791 = vmatmul.mubr.f32.vlgmr.msra.gmra.mxu1 %v140_v46  ;;  %1826 = vmatmul.mubr.f32.vlgmr.msra.gmra.mxu0 %v228_v54  ;;  %v698_v46 = vld [vmem:[#allocation2 + $0x130] sm:$0xff]  ;;  %v794_v54 = vld [vmem:[#allocation2 + $0x5b8] sm:$0xff] }
 0x104   :  { %1829 = vmatpush3.msra.mxu1 %v535_v47  ;;  %1860 = vmatprep.mubr.msk.f32.mxu1 %vm2179_vm0, %v2178_v0  ;;  %v697_v47 = vld [vmem:[#allocation2 + $0xa0] sm:$0xff] }
 0x105   :  { %1830 = vmatprep.subr.mxu1 %v2178_v0  ;;  %1895 = vmatprep.mubr.msk.f32.mxu0 %vm2179_vm0, %v2178_v0 }
 0x106   :  { %1831 = vmatpush3.msra.mxu1 %v534_v49  ;;  %1864 = vmatpush3.msra.mxu0 %v623_v6  ;;  %v799_v49 = vld [vmem:[#allocation2 + $0x888] sm:$0xff]  ;;  %v784_v6 = vld [vmem:[#allocation2 + $0x18] sm:$0xff] }
 0x107   :  { %1832 = vmatprep.subr.mxu1 %v2178_v0  ;;  %1865 = vmatprep.subr.mxu0 %v2178_v0 }
 0x108   :  { %1833 = vmatpush3.msra.mxu1 %v533_v52  ;;  %1866 = vmatpush3.msra.mxu0 %v622_v7  ;;  %v796_v52 = vld [vmem:[#allocation2 + $0x6d8] sm:$0xff] }
 0x109   :  { %1834 = vmatprep.subr.mxu1 %v2178_v0  ;;  %1867 = vmatprep.subr.mxu0 %v2178_v0  ;;  %v933_v7 = vld [vmem:[#allocation2 + $0x898] sm:$0xff] }
 0x10a   :  { %1835 = vmatpush3.msra.mxu1 %v532_v55  ;;  %1868 = vmatpush3.msra.mxu0 %v621_v8  ;;  %v793_v55 = vld [vmem:[#allocation2 + $0x528] sm:$0xff] }
 0x10b   :  { %1836 = vmatprep.subr.mxu1 %v2178_v0  ;;  %1869 = vmatprep.subr.mxu0 %v2178_v0  ;;  %v935_v8 = vld [vmem:[#allocation2 + $0x8a8] sm:$0xff] }
 0x10c   :  { %1837 = vmatpush3.msra.mxu1 %v531_v56  ;;  %1870 = vmatpush3.msra.mxu0 %v620_v9  ;;  %v792_v56 = vld [vmem:[#allocation2 + $0x498] sm:$0xff]  ;;  %v932_v9 = vld [vmem:[#allocation2 + $0x890] sm:$0xff] }
 0x10d   :  { %1838 = vmatprep.subr.mxu1 %v2178_v0  ;;  %1871 = vmatprep.subr.mxu0 %v2178_v0 }
 0x10e   :  { %1839 = vmatpush3.msra.mxu1 %v530_v57  ;;  %1872 = vmatpush3.msra.mxu0 %v619_v10  ;;  %v791_v57 = vld [vmem:[#allocation2 + $0x408] sm:$0xff] }
 0x10f   :  { %1840 = vmatprep.subr.mxu1 %v2178_v0  ;;  %1873 = vmatprep.subr.mxu0 %v2178_v0  ;;  %v929_v10 = vld [vmem:[#allocation2 + $0x808] sm:$0xff] }
 0x110   :  { %1841 = vmatpush3.msra.mxu1 %v529_v58  ;;  %1874 = vmatpush3.msra.mxu0 %v618_v11  ;;  %v790_v58 = vld [vmem:[#allocation2 + $0x378] sm:$0xff]  ;;  %v928_v11 = vld [vmem:[#allocation2 + $0x800] sm:$0xff] }
 0x111   :  { %1842 = vmatprep.subr.mxu1 %v2178_v0  ;;  %1875 = vmatprep.subr.mxu0 %v2178_v0 }
 0x112   :  { %1843 = vmatpush3.msra.mxu1 %v528_v59  ;;  %1876 = vmatpush3.msra.mxu0 %v617_v12  ;;  %v789_v59 = vld [vmem:[#allocation2 + $0x2e8] sm:$0xff]  ;;  %v925_v12 = vld [vmem:[#allocation2 + $0x778] sm:$0xff] }
 0x113   :  { %1844 = vmatprep.subr.mxu1 %v2178_v0  ;;  %1877 = vmatprep.subr.mxu0 %v2178_v0 }
 0x114   :  { %1845 = vmatpush3.msra.mxu1 %v527_v60  ;;  %1878 = vmatpush3.msra.mxu0 %v616_v13  ;;  %v788_v60 = vld [vmem:[#allocation2 + $0x258] sm:$0xff]  ;;  %v924_v13 = vld [vmem:[#allocation2 + $0x770] sm:$0xff] }
 0x115   :  { %1846 = vmatprep.subr.mxu1 %v2178_v0  ;;  %1879 = vmatprep.subr.mxu0 %v2178_v0 }
 0x116   :  { %1847 = vmatpush3.msra.mxu1 %v526_v61  ;;  %1880 = vmatpush3.msra.mxu0 %v615_v14  ;;  %v787_v61 = vld [vmem:[#allocation2 + $0x1c8] sm:$0xff] }
 0x117   :  { %1848 = vmatprep.subr.mxu1 %v2178_v0  ;;  %1881 = vmatprep.subr.mxu0 %v2178_v0  ;;  %v921_v14 = vld [vmem:[#allocation2 + $0x6e8] sm:$0xff] }
 0x118   :  { %1849 = vmatpush3.msra.mxu1 %v525_v62  ;;  %1882 = vmatpush3.msra.mxu0 %v614_v15  ;;  %v624_v62 = vld [vmem:[#allocation4 + $0x1] ss:$0 sm:$0xff] }
 0x119   :  { %1850 = vmatprep.subr.mxu1 %v2178_v0  ;;  %1883 = vmatprep.subr.mxu0 %v2178_v0  ;;  %v920_v15 = vld [vmem:[#allocation2 + $0x6e0] sm:$0xff] }
 0x11a   :  { %1851 = vmatpush3.msra.mxu1 %v524_v63  ;;  %1884 = vmatpush3.msra.mxu0 %v613_v16  ;;  %v917_v16 = vld [vmem:[#allocation2 + $0x658] sm:$0xff] }
 0x11b   :  { %1852 = vmatprep.subr.mxu1 %v2178_v0  ;;  %1885 = vmatprep.subr.mxu0 %v2178_v0 }
 0x11c   :  { %1853 = vmatpush3.msra.mxu1 %v523_v1  ;;  %1886 = vmatpush3.msra.mxu0 %v612_v17  ;;  %v916_v17 = vld [vmem:[#allocation2 + $0x650] sm:$0xff] }
 0x11d   :  { %1854 = vmatprep.subr.mxu1 %v2178_v0  ;;  %1887 = vmatprep.subr.mxu0 %v2178_v0 }
 0x11e   :  { %1855 = vmatpush3.msra.mxu1 %v522_v2  ;;  %1888 = vmatpush3.msra.mxu0 %v611_v18  ;;  %v913_v18 = vld [vmem:[#allocation2 + $0x5c8] sm:$0xff] }
 0x11f   :  { %1856 = vmatprep.subr.mxu1 %v2178_v0  ;;  %1889 = vmatprep.subr.mxu0 %v2178_v0 }
 0x120   :  { %1857 = vmatpush3.msra.mxu1 %v521_v3  ;;  %1890 = vmatpush3.msra.mxu0 %v610_v19  ;;  %v912_v19 = vld [vmem:[#allocation2 + $0x5c0] sm:$0xff] }
 0x121   :  { %1858 = vmatprep.subr.mxu1 %v2178_v0  ;;  %1891 = vmatprep.subr.mxu0 %v2178_v0  ;;  %v2349_v35 = vpop.f32.mrf.mxu0 }
 0x122   :  { %1859 = vmatpush3.msra.mxu1 %v520_v4  ;;  %1892 = vmatpush3.msra.mxu0 %v609_v20  ;;  %v786_v4 = vld [vmem:[#allocation2 + $0x138] sm:$0xff] }
 0x123   :  { %1861 = vmatmul.mubr.f32.vlgmr.msra.gmra.mxu1 %v519_v5  ;;  %1898 = vmatprep.subr.mxu1 %v2178_v0  ;;  %v2353_v37 = vpop.f32.mrf.mxu0  ;;  %v785_v5 = vld [vmem:[#allocation2 + $0xa8] sm:$0xff]  ;;  %v909_v20 = vld [vmem:[#allocation2 + $0x538] sm:$0xff] }
 0x124   :  { %1930 = vmatprep.mubr.msk.f32.mxu1 %vm2179_vm0, %v2178_v0  ;;  %1893 = vmatprep.subr.mxu0 %v2178_v0 }
 0x125   :  { %1894 = vmatpush3.msra.mxu0 %v608_v21  ;;  %1899 = vmatpush3.msra.mxu1 %v711_v22  ;;  %v908_v21 = vld [vmem:[#allocation2 + $0x530] sm:$0xff]  ;;  %v905_v22 = vld [vmem:[#allocation2 + $0x4a8] sm:$0xff] }
 0x126   :  { %1933 = vmatprep.subr.mxu0 %v2178_v0  ;;  %1900 = vmatprep.subr.mxu1 %v2178_v0 }
 0x127   :  { %1901 = vmatpush3.msra.mxu1 %v710_v23  ;;  %v904_v23 = vld [vmem:[#allocation2 + $0x4a0] sm:$0xff] }
 0x128   :  { %1902 = vmatprep.subr.mxu1 %v2178_v0 }
 0x129   :  { %1903 = vmatpush3.msra.mxu1 %v709_v24  ;;  %v901_v24 = vld [vmem:[#allocation2 + $0x418] sm:$0xff] }
 0x12a   :  { %1904 = vmatprep.subr.mxu1 %v2178_v0 }
 0x12b   :  { %1905 = vmatpush3.msra.mxu1 %v708_v25  ;;  %v900_v25 = vld [vmem:[#allocation2 + $0x410] sm:$0xff] }
 0x12c   :  { %1906 = vmatprep.subr.mxu1 %v2178_v0 }
 0x12d   :  { %1907 = vmatpush3.msra.mxu1 %v707_v26  ;;  %v897_v26 = vld [vmem:[#allocation2 + $0x388] sm:$0xff] }
 0x12e   :  { %1908 = vmatprep.subr.mxu1 %v2178_v0 }
 0x12f   :  { %1909 = vmatpush3.msra.mxu1 %v706_v27  ;;  %v896_v27 = vld [vmem:[#allocation2 + $0x380] sm:$0xff] }
 0x130   :  { %1910 = vmatprep.subr.mxu1 %v2178_v0 }
 0x131   :  { %1911 = vmatpush3.msra.mxu1 %v705_v28  ;;  %v893_v28 = vld [vmem:[#allocation2 + $0x2f8] sm:$0xff] }
 0x132   :  { %1912 = vmatprep.subr.mxu1 %v2178_v0 }
 0x133   :  { %1913 = vmatpush3.msra.mxu1 %v704_v29  ;;  %v892_v29 = vld [vmem:[#allocation2 + $0x2f0] sm:$0xff] }
 0x134   :  { %1914 = vmatprep.subr.mxu1 %v2178_v0 }
 0x135   :  { %1915 = vmatpush3.msra.mxu1 %v703_v30  ;;  %v889_v30 = vld [vmem:[#allocation2 + $0x268] sm:$0xff] }
 0x136   :  { %1916 = vmatprep.subr.mxu1 %v2178_v0 }
 0x137   :  { %1917 = vmatpush3.msra.mxu1 %v702_v31  ;;  %v888_v31 = vld [vmem:[#allocation2 + $0x260] sm:$0xff] }
 0x138   :  { %1918 = vmatprep.subr.mxu1 %v2178_v0 }
 0x139   :  { %1919 = vmatpush3.msra.mxu1 %v701_v32  ;;  %v885_v32 = vld [vmem:[#allocation2 + $0x1d8] sm:$0xff] }
 0x13a   :  { %1920 = vmatprep.subr.mxu1 %v2178_v0 }
 0x13b   :  { %1921 = vmatpush3.msra.mxu1 %v700_v33  ;;  %v884_v33 = vld [vmem:[#allocation2 + $0x1d0] sm:$0xff] }
 0x13c   :  { %1922 = vmatprep.subr.mxu1 %v2178_v0 }
 0x13d   :  { %1923 = vmatpush3.msra.mxu1 %v699_v34  ;;  %v881_v34 = vld [vmem:[#allocation2 + $0x148] sm:$0xff] }
 0x13e   :  { %1924 = vmatprep.subr.mxu1 %v2178_v0 }
 0x13f   :  { %1925 = vmatpush3.msra.mxu1 %v698_v46  ;;  %v930_v46 = vld [vmem:[#allocation2 + $0x810] sm:$0xff] }
 0x140   :  { %1926 = vmatprep.subr.mxu1 %v2178_v0 }
 0x141   :  { %1927 = vmatpush3.msra.mxu1 %v697_v47  ;;  %v927_v47 = vld [vmem:[#allocation2 + $0x788] sm:$0xff] }
 0x142   :  { %1928 = vmatprep.subr.mxu1 %v2178_v0 }
 0x143   :  { %1929 = vmatpush3.msra.mxu1 %v696_v48  ;;  %v926_v48 = vld [vmem:[#allocation2 + $0x780] sm:$0xff] }
 0x144   :  { %936 = vmatprep.subr.mxu1 %v933_v7  ;;  %v880_v7 = vld [vmem:[#allocation2 + $0x140] sm:$0xff] }
 0x1c3   :  { %v2351_v36 = vpop.f32.mrf.mxu1  ;;  %v2355_v39 = vpop.f32.mrf.mxu0 }
 0x1c5   :  { %v1792_v38 = vpop.f32.mrf.mxu1  ;;  %v1827_v40 = vpop.f32.mrf.mxu0 }
 0x1c6   :  { %v712_v38 = vld [vmem:[#allocation4 + $0x2] ss:$0 sm:$0xff] }
 0x1e3   :  { %v603_v42 = vpop.f32.mrf.mxu1 }
 0x1e4   :  { %v604_v43 = vadd.f32 %v603_v42, %v536_v41 }
 0x1e5   :  { %v1862_v44 = vpop.f32.mrf.mxu1 }
 0x1e6   :  { %v607_v45 = vmax.f32 %v604_v43, 0.0  ;;  %v934_v44 = vld [vmem:[#allocation2 + $0x8a0] sm:$0xff] }
 0x1e8   :  { %1896 = vmatmul.mubr.f32.vlgmr.msra.gmra.mxu0 %v607_v45  ;;  %v931_v45 = vld [vmem:[#allocation2 + $0x818] sm:$0xff] }
 0x1e9   :  { %1965 = vmatprep.mubr.msk.f32.mxu0 %vm2179_vm0, %v2178_v0  ;;  %1934 = vmatpush3.msra.mxu0 %v799_v49  ;;  %v923_v49 = vld [vmem:[#allocation2 + $0x6f8] sm:$0xff] }
 0x1ea   :  { %1935 = vmatprep.subr.mxu0 %v2178_v0 }
 0x1eb   :  { %1936 = vmatpush3.msra.mxu0 %v798_v50  ;;  %v922_v50 = vld [vmem:[#allocation2 + $0x6f0] sm:$0xff] }
 0x1ec   :  { %1937 = vmatprep.subr.mxu0 %v2178_v0 }
 0x1ed   :  { %1938 = vmatpush3.msra.mxu0 %v797_v51  ;;  %v919_v51 = vld [vmem:[#allocation2 + $0x668] sm:$0xff] }
 0x1ee   :  { %1939 = vmatprep.subr.mxu0 %v2178_v0 }
 0x1ef   :  { %1940 = vmatpush3.msra.mxu0 %v796_v52  ;;  %v918_v52 = vld [vmem:[#allocation2 + $0x660] sm:$0xff] }
 0x1f0   :  { %1941 = vmatprep.subr.mxu0 %v2178_v0 }
 0x1f1   :  { %1942 = vmatpush3.msra.mxu0 %v795_v53  ;;  %v915_v53 = vld [vmem:[#allocation2 + $0x5d8] sm:$0xff] }
 0x1f2   :  { %1943 = vmatprep.subr.mxu0 %v2178_v0 }
 0x1f3   :  { %1944 = vmatpush3.msra.mxu0 %v794_v54  ;;  %v914_v54 = vld [vmem:[#allocation2 + $0x5d0] sm:$0xff] }
 0x1f4   :  { %1945 = vmatprep.subr.mxu0 %v2178_v0 }
 0x1f5   :  { %1946 = vmatpush3.msra.mxu0 %v793_v55  ;;  %v911_v55 = vld [vmem:[#allocation2 + $0x548] sm:$0xff] }
 0x1f6   :  { %1947 = vmatprep.subr.mxu0 %v2178_v0 }
 0x1f7   :  { %1948 = vmatpush3.msra.mxu0 %v792_v56  ;;  %v910_v56 = vld [vmem:[#allocation2 + $0x540] sm:$0xff] }
 0x1f8   :  { %1949 = vmatprep.subr.mxu0 %v2178_v0 }
 0x1f9   :  { %1950 = vmatpush3.msra.mxu0 %v791_v57  ;;  %v907_v57 = vld [vmem:[#allocation2 + $0x4b8] sm:$0xff] }
 0x1fa   :  { %1951 = vmatprep.subr.mxu0 %v2178_v0 }
 0x1fb   :  { %1952 = vmatpush3.msra.mxu0 %v790_v58  ;;  %v906_v58 = vld [vmem:[#allocation2 + $0x4b0] sm:$0xff] }
 0x1fc   :  { %1953 = vmatprep.subr.mxu0 %v2178_v0 }
 0x1fd   :  { %1954 = vmatpush3.msra.mxu0 %v789_v59  ;;  %v903_v59 = vld [vmem:[#allocation2 + $0x428] sm:$0xff] }
 0x1fe   :  { %1955 = vmatprep.subr.mxu0 %v2178_v0 }
 0x1ff   :  { %1956 = vmatpush3.msra.mxu0 %v788_v60  ;;  %v902_v60 = vld [vmem:[#allocation2 + $0x420] sm:$0xff] }
 0x200   :  { %1957 = vmatprep.subr.mxu0 %v2178_v0 }
 0x201   :  { %1958 = vmatpush3.msra.mxu0 %v787_v61  ;;  %v899_v61 = vld [vmem:[#allocation2 + $0x398] sm:$0xff] }
 0x202   :  { %1959 = vmatprep.subr.mxu0 %v2178_v0 }
 0x203   :  { %1960 = vmatpush3.msra.mxu0 %v786_v4  ;;  %v887_v4 = vld [vmem:[#allocation2 + $0x1e8] sm:$0xff] }
 0x204   :  { %1961 = vmatprep.subr.mxu0 %v2178_v0 }
 0x205   :  { %1962 = vmatpush3.msra.mxu0 %v785_v5  ;;  %v886_v5 = vld [vmem:[#allocation2 + $0x1e0] sm:$0xff] }
 0x206   :  { %1963 = vmatprep.subr.mxu0 %v2178_v0 }
 0x207   :  { %1964 = vmatpush3.msra.mxu0 %v784_v6  ;;  %v883_v6 = vld [vmem:[#allocation2 + $0x158] sm:$0xff] }
 0x208   :  { %1007 = vmatprep.subr.mxu0 %v935_v8  ;;  %v882_v8 = vld [vmem:[#allocation2 + $0x150] sm:$0xff] }
 0x2a8   :  { %v691_v63 = vpop.f32.mrf.mxu0 }
 0x2a9   :  { %v692_v1 = vadd.f32 %v691_v63, %v624_v62  ;;  %v898_v62 = vld [vmem:[#allocation2 + $0x390] sm:$0xff]  ;;  %v895_v63 = vld [vmem:[#allocation2 + $0x308] sm:$0xff] }
 0x2aa   :  { %v1897_v2 = vpop.f32.mrf.mxu0 }
 0x2ab   :  { %v695_v3 = vmax.f32 %v692_v1, 0.0  ;;  %v894_v1 = vld [vmem:[#allocation2 + $0x300] sm:$0xff]  ;;  %v891_v2 = vld [vmem:[#allocation2 + $0x278] sm:$0xff] }
 0x2ad   :  { %1931 = vmatmul.mubr.f32.vlgmr.msra.gmra.mxu1 %v695_v3  ;;  %v890_v3 = vld [vmem:[#allocation2 + $0x270] sm:$0xff] }
 0x2ae   :  { %1000 = vmatprep.mubr.f32.mxu1 %v2178_v0  ;;  %937 = vmatpush1.msra.mxu1 %v932_v9  ;;  %v877_v9 = vld [vmem:[#allocation2 + $0xb8] sm:$0xff] }
 0x2af   :  { %938 = vmatprep.subr.mxu1 %v929_v10  ;;  %v879_v10 = vld [vmem:[#allocation2 + $0xc8] sm:$0xff] }
 0x2b0   :  { %939 = vmatpush1.msra.mxu1 %v928_v11  ;;  %v876_v11 = vld [vmem:[#allocation2 + $0xb0] sm:$0xff] }
 0x2b1   :  { %940 = vmatprep.subr.mxu1 %v925_v12  ;;  %v878_v12 = vld [vmem:[#allocation2 + $0xc0] sm:$0xff] }
 0x2b2   :  { %941 = vmatpush1.msra.mxu1 %v924_v13  ;;  %v873_v13 = vld [vmem:[#allocation2 + $0x28] sm:$0xff] }
 0x2b3   :  { %942 = vmatprep.subr.mxu1 %v921_v14  ;;  %v875_v14 = vld [vmem:[#allocation2 + $0x38] sm:$0xff] }
 0x2b4   :  { %943 = vmatpush1.msra.mxu1 %v920_v15  ;;  %v872_v15 = vld [vmem:[#allocation2 + $0x20] sm:$0xff] }
 0x2b5   :  { %944 = vmatprep.subr.mxu1 %v917_v16  ;;  %v874_v16 = vld [vmem:[#allocation2 + $0x30] sm:$0xff] }
 0x2b6   :  { %945 = vmatpush1.msra.mxu1 %v916_v17  ;;  %v800_v17 = vld [vmem:[#allocation4 + $0x3] ss:$0 sm:$0xff] }
 0x2b7   :  { %946 = vmatprep.subr.mxu1 %v913_v18 }
 0x2b8   :  { %947 = vmatpush1.msra.mxu1 %v912_v19 }
 0x2b9   :  { %948 = vmatprep.subr.mxu1 %v909_v20 }
 0x2ba   :  { %949 = vmatpush1.msra.mxu1 %v908_v21 }
 0x2bb   :  { %950 = vmatprep.subr.mxu1 %v905_v22  ;;  %v1117_v22 = vld [vmem:[#allocation2 + $0x8e0] sm:$0xff] }
 0x2bc   :  { %951 = vmatpush1.msra.mxu1 %v904_v23  ;;  %v1133_v23 = vld [vmem:[#allocation2 + $0x8e8] sm:$0xff] }
 0x2bd   :  { %952 = vmatprep.subr.mxu1 %v901_v24  ;;  %v1116_v24 = vld [vmem:[#allocation2 + $0x850] sm:$0xff] }
 0x2be   :  { %953 = vmatpush1.msra.mxu1 %v900_v25  ;;  %v1132_v25 = vld [vmem:[#allocation2 + $0x858] sm:$0xff] }
 0x2bf   :  { %954 = vmatprep.subr.mxu1 %v897_v26  ;;  %v1115_v26 = vld [vmem:[#allocation2 + $0x7c0] sm:$0xff] }
 0x2c0   :  { %955 = vmatpush1.msra.mxu1 %v896_v27  ;;  %v1131_v27 = vld [vmem:[#allocation2 + $0x7c8] sm:$0xff] }
 0x2c1   :  { %956 = vmatprep.subr.mxu1 %v893_v28  ;;  %v1114_v28 = vld [vmem:[#allocation2 + $0x730] sm:$0xff] }
 0x2c2   :  { %957 = vmatpush1.msra.mxu1 %v892_v29  ;;  %v1130_v29 = vld [vmem:[#allocation2 + $0x738] sm:$0xff] }
 0x2c3   :  { %958 = vmatprep.subr.mxu1 %v889_v30  ;;  %v1113_v30 = vld [vmem:[#allocation2 + $0x6a0] sm:$0xff] }
 0x2c4   :  { %959 = vmatpush1.msra.mxu1 %v888_v31  ;;  %v1129_v31 = vld [vmem:[#allocation2 + $0x6a8] sm:$0xff] }
 0x2c5   :  { %960 = vmatprep.subr.mxu1 %v885_v32  ;;  %v1112_v32 = vld [vmem:[#allocation2 + $0x610] sm:$0xff] }
 0x2c6   :  { %961 = vmatpush1.msra.mxu1 %v884_v33  ;;  %v1128_v33 = vld [vmem:[#allocation2 + $0x618] sm:$0xff] }
 0x2c7   :  { %962 = vmatprep.subr.mxu1 %v881_v34  ;;  %v1111_v34 = vld [vmem:[#allocation2 + $0x580] sm:$0xff] }
 0x2c8   :  { %963 = vmatpush1.msra.mxu1 %v880_v7 }
 0x2c9   :  { %964 = vmatprep.subr.mxu1 %v877_v9 }
 0x2ca   :  { %965 = vmatpush1.msra.mxu1 %v876_v11  ;;  %v1378_v11 = vld [vmem:[#allocation2 + $0x8f8] sm:$0xff] }
 0x2cb   :  { %966 = vmatprep.subr.mxu1 %v873_v13  ;;  %v1291_v13 = vld [vmem:[#allocation2 + $0x8f0] sm:$0xff] }
 0x2cc   :  { %967 = vmatpush1.msra.mxu1 %v872_v15  ;;  %v1289_v15 = vld [vmem:[#allocation2 + $0x7d0] sm:$0xff] }
 0x2cd   :  { %1968 = vmatprep.subr.mxu1 %v2178_v0 }
 0x36d   :  { %v779_v40 = vpop.f32.mrf.mxu1 }
 0x36e   :  { %v780_v41 = vadd.f32 %v779_v40, %v712_v38  ;;  %v1127_v38 = vld [vmem:[#allocation2 + $0x588] sm:$0xff]  ;;  %v1110_v40 = vld [vmem:[#allocation2 + $0x4f0] sm:$0xff] }
 0x36f   :  { %v1932_v42 = vpop.f32.mrf.mxu1 }
 0x370   :  { %v783_v43 = vmax.f32 %v780_v41, 0.0  ;;  %v1126_v41 = vld [vmem:[#allocation2 + $0x4f8] sm:$0xff]  ;;  %v1109_v42 = vld [vmem:[#allocation2 + $0x460] sm:$0xff] }
 0x372   :  { %1966 = vmatmul.mubr.f32.vlgmr.msra.gmra.mxu0 %v783_v43  ;;  %v1125_v43 = vld [vmem:[#allocation2 + $0x468] sm:$0xff] }
 0x373   :  { %1008 = vmatpush1.msra.mxu0 %v934_v44  ;;  %1071 = vmatprep.mubr.f32.mxu0 %v2178_v0  ;;  %v1108_v44 = vld [vmem:[#allocation2 + $0x3d0] sm:$0xff] }
 0x374   :  { %1009 = vmatprep.subr.mxu0 %v931_v45  ;;  %v1124_v45 = vld [vmem:[#allocation2 + $0x3d8] sm:$0xff] }
 0x375   :  { %1010 = vmatpush1.msra.mxu0 %v930_v46  ;;  %v1107_v46 = vld [vmem:[#allocation2 + $0x340] sm:$0xff] }
 0x376   :  { %1011 = vmatprep.subr.mxu0 %v927_v47  ;;  %v1123_v47 = vld [vmem:[#allocation2 + $0x348] sm:$0xff] }
 0x377   :  { %1012 = vmatpush1.msra.mxu0 %v926_v48  ;;  %v1106_v48 = vld [vmem:[#allocation2 + $0x2b0] sm:$0xff] }
 0x378   :  { %1013 = vmatprep.subr.mxu0 %v923_v49  ;;  %v1122_v49 = vld [vmem:[#allocation2 + $0x2b8] sm:$0xff] }
 0x379   :  { %1014 = vmatpush1.msra.mxu0 %v922_v50  ;;  %v1105_v50 = vld [vmem:[#allocation2 + $0x220] sm:$0xff] }
 0x37a   :  { %1015 = vmatprep.subr.mxu0 %v919_v51  ;;  %v1121_v51 = vld [vmem:[#allocation2 + $0x228] sm:$0xff] }
 0x37b   :  { %1016 = vmatpush1.msra.mxu0 %v918_v52  ;;  %v1104_v52 = vld [vmem:[#allocation2 + $0x190] sm:$0xff] }
 0x37c   :  { %1017 = vmatprep.subr.mxu0 %v915_v53  ;;  %v1120_v53 = vld [vmem:[#allocation2 + $0x198] sm:$0xff] }
 0x37d   :  { %1018 = vmatpush1.msra.mxu0 %v914_v54  ;;  %v1103_v54 = vld [vmem:[#allocation2 + $0x100] sm:$0xff] }
 0x37e   :  { %1019 = vmatprep.subr.mxu0 %v911_v55  ;;  %v1119_v55 = vld [vmem:[#allocation2 + $0x108] sm:$0xff] }
 0x37f   :  { %1020 = vmatpush1.msra.mxu0 %v910_v56  ;;  %v1102_v56 = vld [vmem:[#allocation2 + $0x70] sm:$0xff] }
 0x380   :  { %1021 = vmatprep.subr.mxu0 %v907_v57  ;;  %v1118_v57 = vld [vmem:[#allocation2 + $0x78] sm:$0xff] }
 0x381   :  { %1022 = vmatpush1.msra.mxu0 %v906_v58  ;;  %v264_v58 = vlaneseq }
 0x382   :  { %1023 = vmatprep.subr.mxu0 %v903_v59 }
 0x383   :  { %1024 = vmatpush1.msra.mxu0 %v902_v60  ;;  %v265_v59 = vshrl.u32 %v264_v58, 7  ;;  %v262_v60 = vld [vmem:[#allocation4 + $0x4] ss:$8 sm:$0x3]  ;;  %v1274_v58 = vld [vmem:[#allocation4 + $0x12] ss:$0 sm:$0xff] }
 0x384   :  { %1025 = vmatprep.subr.mxu0 %v899_v61 }
 0x385   :  { %1026 = vmatpush1.msra.mxu0 %v898_v62  ;;  %v2416_v61 = vsub.s32 0, %v265_v59  ;;  %v270_v62 = vsub.s32 1, %v265_v59 }
 0x386   :  { %1027 = vmatprep.subr.mxu0 %v895_v63 }
 0x387   :  { %1028 = vmatpush1.msra.mxu0 %v894_v1  ;;  %v267_v63 = vrot.slane %v262_v60, %v2416_v61  ;;  %v271_v1 = vrot.slane %v262_v60, %v270_v62 }
 0x388   :  { %1029 = vmatprep.subr.mxu0 %v891_v2 }
 0x389   :  { %1030 = vmatpush1.msra.mxu0 %v890_v3  ;;  %v341_v2 = vadd.f32 %v2349_v35, %v267_v63  ;;  %v343_v3 = vadd.f32 %v2353_v37, %v271_v1  ;;  %v1290_v35 = vld [vmem:[#allocation2 + $0x860] sm:$0xff]  ;;  %v1376_v37 = vld [vmem:[#allocation2 + $0x7d8] sm:$0xff] }
 0x38a   :  { %1031 = vmatprep.subr.mxu0 %v887_v4 }
 0x38b   :  { %1032 = vmatpush1.msra.mxu0 %v886_v5  ;;  %v1081_v4 = vrot.slane %v341_v2, %v2416_v61  ;;  %v1085_v7 = vrot.slane %v343_v3, %v2416_v61 }
 0x38c   :  { %1033 = vmatprep.subr.mxu0 %v883_v6 }
 0x38d   :  { %1034 = vmatpush1.msra.mxu0 %v882_v8 }
 0x38e   :  { %1035 = vmatprep.subr.mxu0 %v879_v10 }
 0x38f   :  { %1036 = vmatpush1.msra.mxu0 %v878_v12 }
 0x390   :  { %1037 = vmatprep.subr.mxu0 %v875_v14  ;;  %v1377_v14 = vld [vmem:[#allocation2 + $0x868] sm:$0xff] }
 0x391   :  { %1038 = vmatpush1.msra.mxu0 %v874_v16  ;;  %v1375_v16 = vld [vmem:[#allocation2 + $0x748] sm:$0xff] }
 0x392   :  { %2003 = vmatprep.subr.mxu0 %v2178_v0 }
 0x432   :  { %v867_v18 = vpop.f32.mrf.mxu0 }
 0x433   :  { %v868_v19 = vadd.f32 %v867_v18, %v800_v17  ;;  %v1288_v17 = vld [vmem:[#allocation2 + $0x740] sm:$0xff]  ;;  %v1374_v18 = vld [vmem:[#allocation2 + $0x6b8] sm:$0xff] }
 0x434   :  { %v1967_v20 = vpop.f32.mrf.mxu0 }
 0x435   :  { %v871_v21 = vmax.f32 %v868_v19, 0.0  ;;  %v1287_v19 = vld [vmem:[#allocation2 + $0x6b0] sm:$0xff]  ;;  %v1373_v20 = vld [vmem:[#allocation2 + $0x628] sm:$0xff] }
 0x437   :  { %1001 = vmatmul.mubr.f32.vlgmr.msra.gmra.mxu1 %v871_v21  ;;  %1072 = vmatmul.mubr.f32.vlgmr.msra.gmra.mxu0 %v871_v21  ;;  %v1286_v21 = vld [vmem:[#allocation2 + $0x620] sm:$0xff] }
 0x438   :  { %2004 = vmatpush3.msra.mxu0 %v1117_v22  ;;  %1969 = vmatpush3.msra.mxu1 %v1133_v23  ;;  %v1372_v22 = vld [vmem:[#allocation2 + $0x598] sm:$0xff]  ;;  %v1285_v23 = vld [vmem:[#allocation2 + $0x590] sm:$0xff] }
 0x439   :  { %2005 = vmatprep.subr.mxu0 %v2178_v0  ;;  %1970 = vmatprep.subr.mxu1 %v2178_v0 }
 0x43a   :  { %2006 = vmatpush3.msra.mxu0 %v1116_v24  ;;  %1971 = vmatpush3.msra.mxu1 %v1132_v25  ;;  %v1371_v24 = vld [vmem:[#allocation2 + $0x508] sm:$0xff]  ;;  %v1284_v25 = vld [vmem:[#allocation2 + $0x500] sm:$0xff] }
 0x43b   :  { %2007 = vmatprep.subr.mxu0 %v2178_v0  ;;  %1972 = vmatprep.subr.mxu1 %v2178_v0 }
 0x43c   :  { %2008 = vmatpush3.msra.mxu0 %v1115_v26  ;;  %1973 = vmatpush3.msra.mxu1 %v1131_v27  ;;  %v1370_v26 = vld [vmem:[#allocation2 + $0x478] sm:$0xff]  ;;  %v1283_v27 = vld [vmem:[#allocation2 + $0x470] sm:$0xff] }
 0x43d   :  { %2009 = vmatprep.subr.mxu0 %v2178_v0  ;;  %1974 = vmatprep.subr.mxu1 %v2178_v0 }
 0x43e   :  { %2010 = vmatpush3.msra.mxu0 %v1114_v28  ;;  %1975 = vmatpush3.msra.mxu1 %v1130_v29  ;;  %v1369_v28 = vld [vmem:[#allocation2 + $0x3e8] sm:$0xff]  ;;  %v448_v29 = vld [vmem:[#allocation4 + $0x6] ss:$0 sm:$0xff] }
 0x43f   :  { %2011 = vmatprep.subr.mxu0 %v2178_v0  ;;  %1976 = vmatprep.subr.mxu1 %v2178_v0 }
 0x440   :  { %2012 = vmatpush3.msra.mxu0 %v1113_v30  ;;  %1977 = vmatpush3.msra.mxu1 %v1129_v31  ;;  %v1282_v30 = vld [vmem:[#allocation2 + $0x3e0] sm:$0xff]  ;;  %v1368_v31 = vld [vmem:[#allocation2 + $0x358] sm:$0xff] }
 0x441   :  { %2013 = vmatprep.subr.mxu0 %v2178_v0  ;;  %1978 = vmatprep.subr.mxu1 %v2178_v0 }
 0x442   :  { %2014 = vmatpush3.msra.mxu0 %v1112_v32  ;;  %1979 = vmatpush3.msra.mxu1 %v1128_v33  ;;  %v361_v32 = vld [vmem:[#allocation4 + $0x5] ss:$0 sm:$0xff] }
 0x443   :  { %2015 = vmatprep.subr.mxu0 %v2178_v0  ;;  %1980 = vmatprep.subr.mxu1 %v2178_v0 }
 0x444   :  { %2016 = vmatpush3.msra.mxu0 %v1111_v34  ;;  %1981 = vmatpush3.msra.mxu1 %v1127_v38  ;;  %v516_v34 = vadd.f32 %v2355_v39, %v448_v29  ;;  %v1281_v38 = vld [vmem:[#allocation2 + $0x350] sm:$0xff] }
 0x445   :  { %2017 = vmatprep.subr.mxu0 %v2178_v0  ;;  %1982 = vmatprep.subr.mxu1 %v2178_v0 }
 0x446   :  { %2018 = vmatpush3.msra.mxu0 %v1110_v40  ;;  %1983 = vmatpush3.msra.mxu1 %v1126_v41  ;;  %v1367_v40 = vld [vmem:[#allocation2 + $0x2c8] sm:$0xff]  ;;  %v429_v41 = vadd.f32 %v2351_v36, %v361_v32  ;;  %v1099_v39 = vrot.slane %v516_v34, %v2416_v61 }
 0x447   :  { %2019 = vmatprep.subr.mxu0 %v2178_v0  ;;  %1984 = vmatprep.subr.mxu1 %v2178_v0 }
 0x448   :  { %2020 = vmatpush3.msra.mxu0 %v1109_v42  ;;  %1985 = vmatpush3.msra.mxu1 %v1125_v43  ;;  %v1280_v42 = vld [vmem:[#allocation2 + $0x2c0] sm:$0xff]  ;;  %v1366_v43 = vld [vmem:[#allocation2 + $0x238] sm:$0xff]  ;;  %v1093_v36 = vrot.slane %v429_v41, %v2416_v61 }
 0x449   :  { %2021 = vmatprep.subr.mxu0 %v2178_v0  ;;  %1986 = vmatprep.subr.mxu1 %v2178_v0 }
 0x44a   :  { %2022 = vmatpush3.msra.mxu0 %v1108_v44  ;;  %1987 = vmatpush3.msra.mxu1 %v1124_v45  ;;  %v1279_v45 = vld [vmem:[#allocation2 + $0x230] sm:$0xff] }
 0x44b   :  { %2023 = vmatprep.subr.mxu0 %v2178_v0  ;;  %1988 = vmatprep.subr.mxu1 %v2178_v0 }
 0x44c   :  { %2024 = vmatpush3.msra.mxu0 %v1107_v46  ;;  %1989 = vmatpush3.msra.mxu1 %v1123_v47  ;;  %v1365_v46 = vld [vmem:[#allocation2 + $0x1a8] sm:$0xff] }
 0x44d   :  { %2025 = vmatprep.subr.mxu0 %v2178_v0  ;;  %1990 = vmatprep.subr.mxu1 %v2178_v0 }
 0x44e   :  { %2026 = vmatpush3.msra.mxu0 %v1106_v48  ;;  %1991 = vmatpush3.msra.mxu1 %v1122_v49  ;;  %v1278_v48 = vld [vmem:[#allocation2 + $0x1a0] sm:$0xff]  ;;  %v1364_v49 = vld [vmem:[#allocation2 + $0x118] sm:$0xff] }
 0x44f   :  { %2027 = vmatprep.subr.mxu0 %v2178_v0  ;;  %1992 = vmatprep.subr.mxu1 %v2178_v0 }
 0x450   :  { %2028 = vmatpush3.msra.mxu0 %v1105_v50  ;;  %1993 = vmatpush3.msra.mxu1 %v1121_v51  ;;  %v1277_v51 = vld [vmem:[#allocation2 + $0x110] sm:$0xff] }
 0x451   :  { %2029 = vmatprep.subr.mxu0 %v2178_v0  ;;  %1994 = vmatprep.subr.mxu1 %v2178_v0 }
 0x452   :  { %2030 = vmatpush3.msra.mxu0 %v1104_v52  ;;  %2035 = vmatprep.mubr.msk.f32.mxu0 %vm2179_vm0, %v2178_v0  ;;  %v1363_v52 = vld [vmem:[#allocation2 + $0x88] sm:$0xff] }
 0x453   :  { %2031 = vmatprep.subr.mxu0 %v2178_v0  ;;  %2000 = vmatprep.mubr.msk.f32.mxu1 %vm2179_vm0, %v2178_v0 }
 0x454   :  { %1995 = vmatpush3.msra.mxu1 %v1120_v53  ;;  %2032 = vmatpush3.msra.mxu0 %v1103_v54  ;;  %v1276_v54 = vld [vmem:[#allocation2 + $0x80] sm:$0xff] }
 0x455   :  { %1996 = vmatprep.subr.mxu1 %v2178_v0  ;;  %2033 = vmatprep.subr.mxu0 %v2178_v0 }
 0x456   :  { %1997 = vmatpush3.msra.mxu1 %v1119_v55  ;;  %2034 = vmatpush3.msra.mxu0 %v1102_v56 }
 0x457   :  { %1998 = vmatprep.subr.mxu1 %v2178_v0  ;;  %2073 = vmatprep.subr.mxu0 %v2178_v0 }
 0x458   :  { %1999 = vmatpush3.msra.mxu1 %v1118_v57 }
 0x459   :  { %2038 = vmatprep.subr.mxu1 %v2178_v0 }
 0x4f7   :  { %v1002_v5 = vpop.f32.mrf.mxu1  ;;  %v1073_v33 = vpop.f32.mrf.mxu0 }
 0x4f8   :  { %v1086_v6 = vadd.f32 %v1081_v4, %v1002_v5  ;;  %v1094_v50 = vadd.f32 %v1093_v36, %v1073_v33  ;;  %v1292_v4 = vld [vmem:[#allocation4 + $0x13] ss:$0 sm:$0xff] }
 0x4f9   :  { %v1004_v8 = vpop.f32.mrf.mxu1  ;;  %v1075_v44 = vpop.f32.mrf.mxu0 }
 0x4fa   :  { %v1088_v9 = vmax.f32 %v1086_v6, 0.0  ;;  %v1087_v10 = vadd.f32 %v1085_v7, %v1004_v8  ;;  %v1100_v47 = vadd.f32 %v1099_v39, %v1075_v44  ;;  %v1095_v55 = vmax.f32 %v1094_v50, 0.0  ;;  %v1379_v8 = vld [vmem:[#allocation4 + $0x14] ss:$0 sm:$0xff] }
 0x4fc   :  { %v1089_v12 = vmax.f32 %v1087_v10, 0.0  ;;  %2036 = vmatmul.mubr.f32.vlgmr.msra.gmra.mxu0 %v1088_v9  ;;  %v1101_v53 = vmax.f32 %v1100_v47, 0.0 }
 0x4fd   :  { %2074 = vmatpush3.msra.mxu0 %v1378_v11  ;;  %2105 = vmatprep.mubr.msk.f32.mxu0 %vm2179_vm0, %v2178_v0 }
 0x4fe   :  { %2075 = vmatprep.subr.mxu0 %v2178_v0  ;;  %2001 = vmatmul.mubr.f32.vlgmr.msra.gmra.mxu1 %v1089_v12 }
 0x4ff   :  { %2039 = vmatpush3.msra.mxu1 %v1291_v13  ;;  %2076 = vmatpush3.msra.mxu0 %v1377_v14 }
 0x500   :  { %2040 = vmatprep.subr.mxu1 %v2178_v0  ;;  %2077 = vmatprep.subr.mxu0 %v2178_v0 }
 0x501   :  { %2041 = vmatpush3.msra.mxu1 %v1290_v35  ;;  %2078 = vmatpush3.msra.mxu0 %v1376_v37 }
 0x502   :  { %2042 = vmatprep.subr.mxu1 %v2178_v0  ;;  %2079 = vmatprep.subr.mxu0 %v2178_v0 }
 0x503   :  { %2043 = vmatpush3.msra.mxu1 %v1289_v15  ;;  %2080 = vmatpush3.msra.mxu0 %v1375_v16 }
 0x504   :  { %2044 = vmatprep.subr.mxu1 %v2178_v0  ;;  %2081 = vmatprep.subr.mxu0 %v2178_v0 }
 0x505   :  { %2045 = vmatpush3.msra.mxu1 %v1288_v17  ;;  %2082 = vmatpush3.msra.mxu0 %v1374_v18 }
 0x506   :  { %2046 = vmatprep.subr.mxu1 %v2178_v0  ;;  %2083 = vmatprep.subr.mxu0 %v2178_v0 }
 0x507   :  { %2047 = vmatpush3.msra.mxu1 %v1287_v19  ;;  %2084 = vmatpush3.msra.mxu0 %v1373_v20 }
 0x508   :  { %2048 = vmatprep.subr.mxu1 %v2178_v0  ;;  %2085 = vmatprep.subr.mxu0 %v2178_v0 }
 0x509   :  { %2049 = vmatpush3.msra.mxu1 %v1286_v21  ;;  %2086 = vmatpush3.msra.mxu0 %v1372_v22 }
 0x50a   :  { %2050 = vmatprep.subr.mxu1 %v2178_v0  ;;  %2087 = vmatprep.subr.mxu0 %v2178_v0 }
 0x50b   :  { %2051 = vmatpush3.msra.mxu1 %v1285_v23  ;;  %2088 = vmatpush3.msra.mxu0 %v1371_v24 }
 0x50c   :  { %2052 = vmatprep.subr.mxu1 %v2178_v0  ;;  %2089 = vmatprep.subr.mxu0 %v2178_v0 }
 0x50d   :  { %2053 = vmatpush3.msra.mxu1 %v1284_v25  ;;  %2090 = vmatpush3.msra.mxu0 %v1370_v26 }
 0x50e   :  { %2054 = vmatprep.subr.mxu1 %v2178_v0  ;;  %2091 = vmatprep.subr.mxu0 %v2178_v0 }
 0x50f   :  { %2055 = vmatpush3.msra.mxu1 %v1283_v27  ;;  %2092 = vmatpush3.msra.mxu0 %v1369_v28 }
 0x510   :  { %2056 = vmatprep.subr.mxu1 %v2178_v0  ;;  %2093 = vmatprep.subr.mxu0 %v2178_v0 }
 0x511   :  { %2057 = vmatpush3.msra.mxu1 %v1282_v30  ;;  %2094 = vmatpush3.msra.mxu0 %v1368_v31 }
 0x512   :  { %2058 = vmatprep.subr.mxu1 %v2178_v0  ;;  %2095 = vmatprep.subr.mxu0 %v2178_v0 }
 0x513   :  { %2059 = vmatpush3.msra.mxu1 %v1281_v38  ;;  %2096 = vmatpush3.msra.mxu0 %v1367_v40 }
 0x514   :  { %2060 = vmatprep.subr.mxu1 %v2178_v0  ;;  %2097 = vmatprep.subr.mxu0 %v2178_v0 }
 0x515   :  { %2061 = vmatpush3.msra.mxu1 %v1280_v42  ;;  %2098 = vmatpush3.msra.mxu0 %v1366_v43 }
 0x516   :  { %2062 = vmatprep.subr.mxu1 %v2178_v0  ;;  %2099 = vmatprep.subr.mxu0 %v2178_v0 }
 0x517   :  { %2063 = vmatpush3.msra.mxu1 %v1279_v45  ;;  %2100 = vmatpush3.msra.mxu0 %v1365_v46 }
 0x518   :  { %2064 = vmatprep.subr.mxu1 %v2178_v0  ;;  %2101 = vmatprep.subr.mxu0 %v2178_v0 }
 0x519   :  { %2065 = vmatpush3.msra.mxu1 %v1278_v48  ;;  %2102 = vmatpush3.msra.mxu0 %v1364_v49 }
 0x51a   :  { %2066 = vmatprep.subr.mxu1 %v2178_v0  ;;  %2103 = vmatprep.subr.mxu0 %v2178_v0 }
 0x51b   :  { %2067 = vmatpush3.msra.mxu1 %v1277_v51  ;;  %2104 = vmatpush3.msra.mxu0 %v1363_v52 }
 0x51c   :  { %2068 = vmatprep.subr.mxu1 %v2178_v0  ;;  %2106 = vmatmul.mubr.f32.vlgmr.msra.gmra.mxu0 %v1101_v53 }
 0x51d   :  { %2069 = vmatpush3.msra.mxu1 %v1276_v54  ;;  %2070 = vmatprep.mubr.msk.f32.mxu1 %vm2179_vm0, %v2178_v0 }
 0x51e   :  { %2071 = vmatmul.mubr.f32.vlgmr.msra.gmra.mxu1 %v1095_v55 }
 0x5bc   :  { %v1270_v56 = vpop.f32.mrf.mxu0 }
 0x5be   :  { %v1200_v57 = vpop.f32.mrf.mxu1  ;;  %v2037_v59 = vpop.f32.mrf.mxu0 }
 0x5bf   :  { %v1271_v60 = vadd.f32 %v1270_v56, %v1200_v57 }
 0x5c0   :  { %v2002_v61 = vpop.f32.mrf.mxu1 }
 0x5c1   :  { %v1275_v62 = vadd.f32 %v1274_v58, %v1271_v60 }
 0x5c3   :  { %v1483_v63 = vmul.f32 -1.442695, %v1275_v62 }
 0x5c5   :  { %2116 = vpow2.f32 %v1483_v63 }
 0x5d2   :  { %v2117_v1 = vpop.eup %2116 }
 0x5d3   :  { %v1453_v2 = vadd.f32 1.0, %v2117_v1 }
 0x5d5   :  { %2118 = vrcp.f32 %v1453_v2 }
 0x5dc   :  { %v1446_v3 = vpop.f32.mrf.mxu0 }
 0x5dd   :  { %v1447_v10 = vadd.f32 %v1446_v3, %v1379_v8 }
 0x5de   :  { %v1359_v5 = vpop.f32.mrf.mxu1  ;;  %v2107_v6 = vpop.f32.mrf.mxu0 }
 0x5df   :  { %v1360_v7 = vadd.f32 %v1359_v5, %v1292_v4 }
 0x5e0   :  { %v2072_v0 = vpop.f32.mrf.mxu1 }
 0x5e1   :  { %1457 = vmax.xlane.f32.xlu0 %v1360_v7 }
 0x5e2   :  { %v2119_v9 = vpop.eup %2118 }
 0x5e3   :  { %1456 = vst [vmem:[%s2474_s4] sm:$0xff] %v2119_v9 }
 0x5e5   :  { %1467 = vmax.xlane.f32.xlu0 %v1447_v10 }
 0x66a   :  { %v1458_v11 = vpop.xlane.xlu0 %1457 }
 0x66b   :  { %v1459_v12 = vsub.f32 %v1360_v7, %v1458_v11 }
 0x66d   :  { %v1460_v13 = vmul.f32 1.442695, %v1459_v12 }
 0x66e   :  { %v1468_v14 = vpop.xlane.xlu0 %1467 }
 0x66f   :  { %2120 = vpow2.f32 %v1460_v13  ;;  %v1469_v35 = vsub.f32 %v1447_v10, %v1468_v14 }
 0x671   :  { %v1470_v37 = vmul.f32 1.442695, %v1469_v35 }
 0x673   :  { %2122 = vpow2.f32 %v1470_v37 }
 0x67c   :  { %v2121_v15 = vpop.eup %2120 }
 0x67d   :  { %1462 = vadd.xlane.f32.xlu1 %v2121_v15 }
 0x680   :  { %v2123_v16 = vpop.eup %2122 }
 0x681   :  { %1472 = vadd.xlane.f32.xlu1 %v2123_v16 }
 0x706   :  { %v1463_v17 = vpop.xlane.xlu1 %1462 }
 0x707   :  { %2124 = vrcp.f32 %v1463_v17 }
 0x70a   :  { %v1473_v18 = vpop.xlane.xlu1 %1472 }
 0x70b   :  { %2126 = vrcp.f32 %v1473_v18 }
 0x714   :  { %v2125_v19 = vpop.eup %2124 }
 0x715   :  { %v1465_v20 = vmul.f32 %v2125_v19, %v2121_v15 }
 0x717   :  { %1466 = vst [vmem:[%s2474_s4 + $0x8] sm:$0xff] %v1465_v20 }
 0x718   :  { %v2127_v21 = vpop.eup %2126 }
 0x719   :  { %v1475_v22 = vmul.f32 %v2127_v21, %v2123_v16 }
 0x71b   :  { %1476 = vst [vmem:[%s2474_s4 + $0x10] sm:$0xff] %v1475_v22 }
 0x71c   :  { %1481 = vsyncpa [#allocation3], 1 }
 0x71d   :  { %1482 = vsyncpa [#allocation5], 1 }

</bundles_post_ra>
